<compile_context>
chip_gen: v6e
topology: v6e:2x2x1
jax: 0.10.0
libtpu: 0.0.40
codegen_flags: <defaults>
</compile_context>

<pallas_src>
import functools

import jax
import jax.numpy as jnp
from jax import lax
from jax.experimental import pallas as pl
from jax.experimental.pallas import tpu as pltpu

_NEG_BIG = -1.0e30  # finite "-inf" sentinel (avoids any -inf NaN lowering concerns)


def _round_up(n: int, m: int) -> int:
    return ((n + m - 1) // m) * m


def _tpu_vmem_bytes() -> int:
    try:
        return int(pltpu.get_tpu_info().vmem_capacity_bytes)
    except Exception:
        return 64 << 20  # conservative (v7x-sized) default


def _min_gru_kernel(x_ref, w_ref, reset_ref, o_ref, h_carry_ref, *, chunk: int, di_tile: int):
    # x_ref:       (chunk, Dp)      one sequence chunk of one batch element
    # w_ref:       (Dp, 2*Tdi)      fused [hidden | gate] weight tile (pre-transposed)
    # reset_ref:   (chunk, 1)       1.0 where a position starts a new segment
    # o_ref:       (chunk, Tdi)     scan output tile
    # h_carry_ref: (1, Tdi) f32     log h at the last row of the previous chunk
    c = pl.program_id(2)

    @pl.when(c == 0)
    def _():
        h_carry_ref[...] = jnp.full_like(h_carry_ref, _NEG_BIG)

    # one fused matmul (bf16 x bf16 on the MXU, f32 accumulation), split in VMEM
    hg = jnp.dot(x_ref[...], w_ref[...], preferred_element_type=jnp.float32)  # (chunk, 2*Tdi)
    hidden = hg[:, :di_tile]
    gate = hg[:, di_tile:]

    # log-space quantities (log_z = -softplus(-gate) = gate + log_coeffs: saves a softplus)
    log_coeffs = -jax.nn.softplus(gate)                          # log(1 - z)
    log_z = gate + log_coeffs                                    # log(z)
    log_tilde_h = jnp.where(                                     # log_g(hidden)
        hidden >= 0.0,
        jnp.log(jnp.maximum(hidden, 0.0) + 0.5),
        -jax.nn.softplus(-hidden),
    )
    log_values = log_z + log_tilde_h

    # reset masking (penalty = -100, as in the PyTorch reference)
    reset = reset_ref[...] > 0.5                                 # (chunk, 1) -> lane bcast
    penalty = jnp.float32(-100.0)
    log_coeffs = jnp.where(reset, penalty, log_coeffs)
    log_values = jnp.where(reset, penalty, log_values)

    # Within-chunk Hillis-Steele scans: log2(chunk) XLU rolls + VPU/EUP combines.
    pos = lax.broadcasted_iota(jnp.int32, (chunk, 1), 0)

    # a_local = cumsum(log_coeffs) within this chunk
    a_local = log_coeffs
    step = 1
    while step < chunk:
        shifted = pltpu.roll(a_local, shift=step, axis=0)
        a_local = a_local + jnp.where(pos < step, 0.0, shifted)
        step *= 2

    # lse_local = logcumsumexp(log_values - a_local) within this chunk
    r = log_values - a_local
    step = 1
    while step < chunk:
        shifted = pltpu.roll(r, shift=step, axis=0)
        r = jnp.logaddexp(r, jnp.where(pos < step, _NEG_BIG, shifted))
        step *= 2

    # Fold in the carried hidden state from previous chunks of this sequence:
    #   log h_t = a_local[t] + logaddexp(log h_prev, lse_local[t])
    log_h = a_local + jnp.logaddexp(h_carry_ref[...], r)
    o_ref[...] = jnp.exp(log_h).astype(o_ref.dtype)
    h_carry_ref[...] = log_h[chunk - 1:chunk, :]                 # carry for the next chunk


def prepare_min_gru_weights(w_hidden_gate, *, di_tile=None, dtype=jnp.bfloat16):
    """Convert the PyTorch nn.Linear weight [2*Di, D] (rows = [hidden; gate]) into
    the kernel's fused, transposed, 128-padded, per-Di-tile-interleaved layout.
    Call ONCE at init time, not per forward."""
    two_di, d = w_hidden_gate.shape
    di = two_di // 2
    # K (and Di) padded to 128 lanes only. Padding K to 256 (v6e/v7x MXU width)
    # would also widen the per-call x padding; this kernel is EUP/DMA-bound, not
    # MXU-bound, so 128 is the better trade-off. Model-level D, Di that are
    # multiples of 128 avoid the pad/slice entirely.
    dp = _round_up(d, 128)
    dip = _round_up(di, 128)

    small_vmem = _tpu_vmem_bytes() <= (64 << 20)  # v7x-class chip
    if di_tile is None:
        # Prefer ndt == 1 (single weight tile, single-buffered, DMA'd exactly once)
        # whenever the fused weight block fits the per-generation budget.
        w_budget = (8 << 20) if small_vmem else (20 << 20)
        cap = min(dip, max(128, (w_budget // (dp * 2 * 2)) // 128 * 128))
        di_tile = 128
        for cand in range(cap, 127, -128):
            if dip % cand == 0:
                di_tile = cand
                break
    assert dip % di_tile == 0 and di_tile % 128 == 0
    ndt = dip // di_tile

    wh = jnp.zeros((dp, dip), dtype).at[:d, :di].set(w_hidden_gate[:di, :].T.astype(dtype))
    wg = jnp.zeros((dp, dip), dtype).at[:d, :di].set(w_hidden_gate[di:, :].T.astype(dtype))
    # interleave per Di-tile: columns of tile j are [hidden_j | gate_j]
    w_fused = jnp.stack(
        [wh.reshape(dp, ndt, di_tile), wg.reshape(dp, ndt, di_tile)], axis=2
    ).reshape(dp, ndt * 2 * di_tile)

    meta = dict(d=d, di=di, dp=dp, dip=dip, di_tile=di_tile, ndt=ndt,
                small_vmem=small_vmem)
    return w_fused, meta


def min_gru_forward(x, w_fused, meta, input_ids=None, *, out_dtype=None, chunk=None):
    """MinGRU forward (prev_hidden=None path, expansion_factor=1.0 -> to_out=Identity).

    x:       [B, S, D]  (bf16 recommended for MXU throughput)
    w_fused: prepared weight from prepare_min_gru_weights
    Returns (out [B, S, Di], next_prev_hidden [B, 1, Di]).
    """
    b, s, d = x.shape
    assert d == meta["d"]
    dp, dip, tdi, ndt, di = meta["dp"], meta["dip"], meta["di_tile"], meta["ndt"], meta["di"]
    small_vmem = meta.get("small_vmem", True)
    if out_dtype is None:
        out_dtype = x.dtype  # bf16 output halves the writeback DMA in production

    # ---- sequence chunking: bounds VMEM and cuts scan depth to log2(chunk) ----
    sp = _round_up(s, 8)
    if chunk is None:
        chunk_cap = 256 if small_vmem else 512
        chunk = 8
        for cand in range(min(sp, (chunk_cap // 8) * 8), 7, -8):
            if sp % cand == 0:
                chunk = cand
                break
    else:
        assert sp % chunk == 0 and (chunk % 8 == 0 or chunk == sp)
    nsc = sp // chunk

    # ---- host-side prep: reset rows + padding to (sp, dp) (no-op if aligned) ----
    if input_ids is not None:
        pad_mask = input_ids == 0
    else:
        pad_mask = jnp.zeros((b, s), dtype=bool)
    # position t resets iff token t-1 of the same sequence is pad (id == 0)
    reset = jnp.concatenate([jnp.zeros((b, 1), dtype=bool), pad_mask[:, :-1]], axis=1)

    if sp > s or dp > d:
        x = jnp.pad(x, ((0, 0), (0, sp - s), (0, dp - d)))
    if sp > s:
        reset = jnp.pad(reset, ((0, 0), (0, sp - s)))
    x2 = x.reshape(b * sp, dp)
    reset_f32 = reset.astype(jnp.float32).reshape(b * sp, 1)

    kernel = functools.partial(_min_gru_kernel, chunk=chunk, di_tile=tdi)

    # grid: Di-tile axis outermost (each weight tile is DMA'd exactly once),
    # batch next (parallel across TensorCores on v7x), sequence chunks innermost
    # and sequential ("arbitrary") so the hidden-state carry in scratch is valid.
    grid = (ndt, b, nsc)

    w_block_bytes = dp * 2 * tdi * w_fused.dtype.itemsize
    flops = 2 * (b * sp) * dp * (2 * dip)
    transc = (2 * max(1, chunk - 1).bit_length() + 8) * (b * sp) * dip
    bytes_acc = (ndt * x2.size * x2.dtype.itemsize
                 + w_fused.size * w_fused.dtype.itemsize
                 + ndt * reset_f32.size * 4
                 + b * sp * dip * jnp.dtype(out_dtype).itemsize)
    vmem_cap = _tpu_vmem_bytes()
    vmem_limit = int(min(max(32 << 20, vmem_cap - (16 << 20)), 112 << 20))

    def build(single_buffer_w: bool):
        w_kwargs = {"pipeline_mode": pl.Buffered(1)} if single_buffer_w else {}
        return pl.pallas_call(
            kernel,
            out_shape=jax.ShapeDtypeStruct((b * sp, dip), out_dtype),
            grid_spec=pltpu.PrefetchScalarGridSpec(
                num_scalar_prefetch=0,
                grid=grid,
                in_specs=[
                    pl.BlockSpec((chunk, dp), lambda j, i, c: (i * nsc + c, 0)),
                    pl.BlockSpec((dp, 2 * tdi), lambda j, i, c: (0, j), **w_kwargs),
                    pl.BlockSpec((chunk, 1), lambda j, i, c: (i * nsc + c, 0)),
                ],
                out_specs=pl.BlockSpec((chunk, tdi), lambda j, i, c: (i * nsc + c, j)),
                scratch_shapes=[pltpu.VMEM((1, tdi), jnp.float32)],
            ),
            compiler_params=pltpu.CompilerParams(
                dimension_semantics=("parallel", "parallel", "arbitrary"),
                vmem_limit_bytes=vmem_limit,
            ),
            cost_estimate=pl.CostEstimate(
                flops=flops, transcendentals=transc, bytes_accessed=bytes_acc),
        )

    # Weight block index is constant across both inner grid axes -> the second
    # pipeline buffer is wasted VMEM; reclaim it (with a fallback if Buffered(1)
    # is not supported by this jax version).
    single_w = (ndt == 1) or (w_block_bytes >= (2 << 20))
    if single_w:
        try:
            out_flat = build(True)(x2, w_fused, reset_f32)
        except Exception:
            out_flat = build(False)(x2, w_fused, reset_f32)
    else:
        out_flat = build(False)(x2, w_fused, reset_f32)

    out = out_flat.reshape(b, sp, dip)
    if sp > s:
        out = out[:, :s, :]
    if dip > di:
        out = out[:, :, :di]
    next_prev_hidden = jnp.where(pad_mask[:, -1:, None], 0.0, out[:, -1:, :])
    # to_out is Identity for expansion_factor == 1.0 (the module default)
    return out, next_prev_hidden


def _reference(x, w_hidden_gate, input_ids):
    """Pure-JAX reference mirroring the PyTorch forward (prev_hidden=None)."""
    b, s, _ = x.shape
    di = w_hidden_gate.shape[0] // 2
    xf = x.astype(jnp.float32)
    wf = w_hidden_gate.astype(jnp.float32)
    hg = xf @ wf.T
    hidden, gate = hg[..., :di], hg[..., di:]
    pad_mask = (input_ids == 0) if input_ids is not None else jnp.zeros((b, s), bool)
    log_coeffs = -jax.nn.softplus(gate)
    log_z = -jax.nn.softplus(-gate)
    log_tilde_h = jnp.where(hidden >= 0, jnp.log(jnp.maximum(hidden, 0.0) + 0.5),
                            -jax.nn.softplus(-hidden))
    log_values = log_z + log_tilde_h
    reset = jnp.concatenate([jnp.zeros((b, 1), bool), pad_mask[:, :-1]], axis=1)[:, :, None]
    log_coeffs = jnp.where(reset, -100.0, log_coeffs)
    log_values = jnp.where(reset, -100.0, log_values)
    a_star = jnp.cumsum(log_coeffs, axis=1)
    lse = lax.cumlogsumexp(log_values - a_star, axis=1)
    out = jnp.exp(a_star + lse)
    next_h = jnp.where(pad_mask[:, -1:, None], 0.0, out[:, -1:, :])
    return out, next_h


if __name__ == "__main__":
    base_key = jax.random.PRNGKey(0)

    def run_case(B, S, D, chunk=None, seed=0):
        kx, kw, kid = jax.random.split(jax.random.fold_in(base_key, seed), 3)
        x = jax.random.normal(kx, (B, S, D), dtype=jnp.float32).astype(jnp.bfloat16)
        bound = 1.0 / (D ** 0.5)  # nn.Linear default init
        w_hidden_gate = jax.random.uniform(
            kw, (2 * D, D), minval=-bound, maxval=bound, dtype=jnp.float32
        ).astype(jnp.bfloat16)
        input_ids = jax.random.randint(kid, (B, S), 0, 5, dtype=jnp.int32)

        w_fused, meta = prepare_min_gru_weights(w_hidden_gate)  # once, at "init"
        # out_dtype=f32 here for a tight correctness check; the default (x.dtype =
        # bf16) is recommended in production to halve the output writeback DMA.
        out, next_h = min_gru_forward(x, w_fused, meta, input_ids,
                                      out_dtype=jnp.float32, chunk=chunk)
        out = jax.block_until_ready(out)
        next_h = jax.block_until_ready(next_h)

        ref_out, ref_next = _reference(x, w_hidden_gate, input_ids)
        assert out.shape == (B, S, D) and next_h.shape == (B, 1, D)
        assert jnp.allclose(out, ref_out, atol=1e-3, rtol=1e-3), "output mismatch"
        assert jnp.allclose(next_h, ref_next, atol=1e-3, rtol=1e-3), "hidden mismatch"

    # small canonical case (single sequence chunk)
    run_case(2, 8, 32, seed=0)
    # multi-chunk case: exercises the carried hidden state across sequence chunks
    # (4 chunks of 8) and the seq-length padding path (28 -> 32 rows)
    run_case(2, 28, 32, chunk=8, seed=1)

    print("KERNEL_OK")
</pallas_src>

<mosaic_0001>
module attributes {stable_mosaic.version = 11 : i64} {
  func.func @_min_gru_kernel(%arg0: i32, %arg1: i32, %arg2: i32, %arg3: memref<8x128xbf16, #tpu.memory_space<vmem>>, %arg4: memref<128x256xbf16, #tpu.memory_space<vmem>>, %arg5: memref<8x1xf32, #tpu.memory_space<vmem>>, %arg6: memref<8x128xf32, #tpu.memory_space<vmem>>, %arg7: memref<1x128xf32, #tpu.memory_space<vmem>>) attributes {dimension_semantics = [#tpu.dimension_semantics<parallel>, #tpu.dimension_semantics<parallel>, #tpu.dimension_semantics<arbitrary>], iteration_bounds = array<i64: 1, 2, 1>, scalar_prefetch = 0 : i64, scratch_operands = 1 : i64, tpu.core_type = #tpu.core_type<tc>, window_params = [{transform_indices = @transform_0, window_bounds = array<i64: 8, 128>}, {pipeline_mode = #tpu.pipeline_mode<synchronous>, transform_indices = @transform_1, window_bounds = array<i64: 128, 256>}, {transform_indices = @transform_2, window_bounds = array<i64: 8, 1>}, {transform_indices = @transform_3, window_bounds = array<i64: 8, 128>}]} {
    %c0_i32 = arith.constant 0 : i32
    %0 = arith.cmpi eq, %arg2, %c0_i32 : i32
    %1 = arith.extui %0 : i1 to i32
    %c0_i32_0 = arith.constant 0 : i32
    %2 = arith.cmpi ne, %1, %c0_i32_0 : i32
    scf.if %2 {
      %cst_44 = arith.constant -1.000000e+30 : f32
      %163 = vector.broadcast %cst_44 : f32 to vector<1x128xf32>
      %c0_45 = arith.constant 0 : index
      %c0_46 = arith.constant 0 : index
      %164 = vector.load %arg7[%c0_45, %c0_46] : memref<1x128xf32, #tpu.memory_space<vmem>>, vector<1x128xf32>
      tpu.vector_store %arg7[%c0_45, %c0_46], %163 {strides = array<i32>} : memref<1x128xf32, #tpu.memory_space<vmem>>, vector<1x128xf32>,
    } else {
    }
    %c0 = arith.constant 0 : index
    %c0_1 = arith.constant 0 : index
    %3 = vector.load %arg3[%c0, %c0_1] : memref<8x128xbf16, #tpu.memory_space<vmem>>, vector<8x128xbf16>
    %c0_2 = arith.constant 0 : index
    %c0_3 = arith.constant 0 : index
    %4 = vector.load %arg4[%c0_2, %c0_3] : memref<128x256xbf16, #tpu.memory_space<vmem>>, vector<128x256xbf16>
    %cst = arith.constant dense<0.000000e+00> : vector<8x256xf32>
    %5 = tpu.matmul %3, %4, %cst {dimension_numbers = #tpu.dot_dimension_numbers<[1], [0], [0], [1], [0, 0, 1, 1], [], []>} : vector<8x128xbf16>, vector<128x256xbf16>, vector<8x256xf32> -> vector<8x256xf32>
    %6 = vector.extract_strided_slice %5 {offsets = [0, 0], sizes = [8, 128], strides = [1, 1]} : vector<8x256xf32> to vector<8x128xf32>
    %7 = vector.extract_strided_slice %5 {offsets = [0, 128], sizes = [8, 128], strides = [1, 1]} : vector<8x256xf32> to vector<8x128xf32>
    %cst_4 = arith.constant 0.000000e+00 : f32
    %8 = vector.broadcast %cst_4 : f32 to vector<8x128xf32>
    %9 = arith.maximumf %7, %8 : vector<8x128xf32>
    %10 = vector.broadcast %cst_4 : f32 to vector<8x128xf32>
    %11 = arith.subf %7, %10 : vector<8x128xf32>
    %12 = arith.cmpf one, %11, %11 : vector<8x128xf32>
    %13 = vector.broadcast %cst_4 : f32 to vector<8x128xf32>
    %14 = arith.addf %7, %13 : vector<8x128xf32>
    %15 = math.absf %11 : vector<8x128xf32>
    %cst_5 = arith.constant 0.000000e+00 : f32
    %16 = vector.broadcast %cst_5 : f32 to vector<8x128xf32>
    %17 = arith.subf %16, %15 : vector<8x128xf32>
    %18 = math.exp %17 : vector<8x128xf32>
    %19 = math.log1p %18 : vector<8x128xf32>
    %20 = arith.addf %9, %19 : vector<8x128xf32>
    %21 = arith.select %12, %14, %20 : vector<8x128xi1>, vector<8x128xf32>
    %cst_6 = arith.constant 0.000000e+00 : f32
    %22 = vector.broadcast %cst_6 : f32 to vector<8x128xf32>
    %23 = arith.subf %22, %21 : vector<8x128xf32>
    %24 = arith.addf %7, %23 : vector<8x128xf32>
    %cst_7 = arith.constant 0.000000e+00 : f32
    %25 = vector.broadcast %cst_7 : f32 to vector<8x128xf32>
    %26 = arith.cmpf oge, %6, %25 : vector<8x128xf32>
    %cst_8 = arith.constant 0.000000e+00 : f32
    %27 = vector.broadcast %cst_8 : f32 to vector<8x128xf32>
    %28 = arith.maximumf %6, %27 : vector<8x128xf32>
    %cst_9 = arith.constant 5.000000e-01 : f32
    %29 = vector.broadcast %cst_9 : f32 to vector<8x128xf32>
    %30 = arith.addf %28, %29 : vector<8x128xf32>
    %31 = math.log %30 : vector<8x128xf32>
    %cst_10 = arith.constant 0.000000e+00 : f32
    %32 = vector.broadcast %cst_10 : f32 to vector<8x128xf32>
    %33 = arith.subf %32, %6 : vector<8x128xf32>
    %cst_11 = arith.constant 0.000000e+00 : f32
    %34 = vector.broadcast %cst_11 : f32 to vector<8x128xf32>
    %35 = arith.maximumf %33, %34 : vector<8x128xf32>
    %36 = vector.broadcast %cst_11 : f32 to vector<8x128xf32>
    %37 = arith.subf %33, %36 : vector<8x128xf32>
    %38 = arith.cmpf one, %37, %37 : vector<8x128xf32>
    %39 = vector.broadcast %cst_11 : f32 to vector<8x128xf32>
    %40 = arith.addf %33, %39 : vector<8x128xf32>
    %41 = math.absf %37 : vector<8x128xf32>
    %cst_12 = arith.constant 0.000000e+00 : f32
    %42 = vector.broadcast %cst_12 : f32 to vector<8x128xf32>
    %43 = arith.subf %42, %41 : vector<8x128xf32>
    %44 = math.exp %43 : vector<8x128xf32>
    %45 = math.log1p %44 : vector<8x128xf32>
    %46 = arith.addf %35, %45 : vector<8x128xf32>
    %47 = arith.select %38, %40, %46 : vector<8x128xi1>, vector<8x128xf32>
    %cst_13 = arith.constant 0.000000e+00 : f32
    %48 = vector.broadcast %cst_13 : f32 to vector<8x128xf32>
    %49 = arith.subf %48, %47 : vector<8x128xf32>
    %50 = arith.select %26, %31, %49 : vector<8x128xi1>, vector<8x128xf32>
    %51 = arith.addf %24, %50 : vector<8x128xf32>
    %c0_14 = arith.constant 0 : index
    %c0_15 = arith.constant 0 : index
    %52 = vector.load %arg5[%c0_14, %c0_15] : memref<8x1xf32, #tpu.memory_space<vmem>>, vector<8x1xf32>
    %cst_16 = arith.constant 5.000000e-01 : f32
    %53 = vector.broadcast %cst_16 : f32 to vector<8x1xf32>
    %54 = arith.cmpf ogt, %52, %53 : vector<8x1xf32>
    %cst_17 = arith.constant -1.000000e+02 : f32
    %55 = vector.shape_cast %54 : vector<8x1xi1> to vector<8x1xi1>
    %56 = vector.broadcast %55 : vector<8x1xi1> to vector<8x128xi1>
    %57 = vector.broadcast %cst_17 : f32 to vector<8x128xf32>
    %58 = arith.select %56, %57, %23 : vector<8x128xi1>, vector<8x128xf32>
    %cst_18 = arith.constant -1.000000e+02 : f32
    %59 = vector.shape_cast %54 : vector<8x1xi1> to vector<8x1xi1>
    %60 = vector.broadcast %59 : vector<8x1xi1> to vector<8x128xi1>
    %61 = vector.broadcast %cst_18 : f32 to vector<8x128xf32>
    %62 = arith.select %60, %61, %51 : vector<8x128xi1>, vector<8x128xf32>
    %63 = tpu.iota {dimensions = array<i32: 0>} : vector<8x1xi32>
    %c1_i32 = arith.constant 1 : i32
    %64 = tpu.dynamic_rotate %58 by %c1_i32 dim 0 : vector<8x128xf32>, i32 -> vector<8x128xf32>
    %c1_i32_19 = arith.constant 1 : i32
    %65 = vector.broadcast %c1_i32_19 : i32 to vector<8x1xi32>
    %66 = arith.cmpi slt, %63, %65 : vector<8x1xi32>
    %cst_20 = arith.constant 0.000000e+00 : f32
    %67 = vector.shape_cast %66 : vector<8x1xi1> to vector<8x1xi1>
    %68 = vector.broadcast %67 : vector<8x1xi1> to vector<8x128xi1>
    %69 = vector.broadcast %cst_20 : f32 to vector<8x128xf32>
    %70 = arith.select %68, %69, %64 : vector<8x128xi1>, vector<8x128xf32>
    %71 = arith.addf %58, %70 : vector<8x128xf32>
    %c2_i32 = arith.constant 2 : i32
    %72 = tpu.dynamic_rotate %71 by %c2_i32 dim 0 : vector<8x128xf32>, i32 -> vector<8x128xf32>
    %c2_i32_21 = arith.constant 2 : i32
    %73 = vector.broadcast %c2_i32_21 : i32 to vector<8x1xi32>
    %74 = arith.cmpi slt, %63, %73 : vector<8x1xi32>
    %cst_22 = arith.constant 0.000000e+00 : f32
    %75 = vector.shape_cast %74 : vector<8x1xi1> to vector<8x1xi1>
    %76 = vector.broadcast %75 : vector<8x1xi1> to vector<8x128xi1>
    %77 = vector.broadcast %cst_22 : f32 to vector<8x128xf32>
    %78 = arith.select %76, %77, %72 : vector<8x128xi1>, vector<8x128xf32>
    %79 = arith.addf %71, %78 : vector<8x128xf32>
    %c4_i32 = arith.constant 4 : i32
    %80 = tpu.dynamic_rotate %79 by %c4_i32 dim 0 : vector<8x128xf32>, i32 -> vector<8x128xf32>
    %c4_i32_23 = arith.constant 4 : i32
    %81 = vector.broadcast %c4_i32_23 : i32 to vector<8x1xi32>
    %82 = arith.cmpi slt, %63, %81 : vector<8x1xi32>
    %cst_24 = arith.constant 0.000000e+00 : f32
    %83 = vector.shape_cast %82 : vector<8x1xi1> to vector<8x1xi1>
    %84 = vector.broadcast %83 : vector<8x1xi1> to vector<8x128xi1>
    %85 = vector.broadcast %cst_24 : f32 to vector<8x128xf32>
    %86 = arith.select %84, %85, %80 : vector<8x128xi1>, vector<8x128xf32>
    %87 = arith.addf %79, %86 : vector<8x128xf32>
    %88 = arith.subf %62, %87 : vector<8x128xf32>
    %c1_i32_25 = arith.constant 1 : i32
    %89 = tpu.dynamic_rotate %88 by %c1_i32_25 dim 0 : vector<8x128xf32>, i32 -> vector<8x128xf32>
    %c1_i32_26 = arith.constant 1 : i32
    %90 = vector.broadcast %c1_i32_26 : i32 to vector<8x1xi32>
    %91 = arith.cmpi slt, %63, %90 : vector<8x1xi32>
    %cst_27 = arith.constant -1.000000e+30 : f32
    %92 = vector.shape_cast %91 : vector<8x1xi1> to vector<8x1xi1>
    %93 = vector.broadcast %92 : vector<8x1xi1> to vector<8x128xi1>
    %94 = vector.broadcast %cst_27 : f32 to vector<8x128xf32>
    %95 = arith.select %93, %94, %89 : vector<8x128xi1>, vector<8x128xf32>
    %96 = arith.maximumf %88, %95 : vector<8x128xf32>
    %97 = arith.subf %88, %95 : vector<8x128xf32>
    %98 = arith.cmpf one, %97, %97 : vector<8x128xf32>
    %99 = arith.addf %88, %95 : vector<8x128xf32>
    %100 = math.absf %97 : vector<8x128xf32>
    %cst_28 = arith.constant 0.000000e+00 : f32
    %101 = vector.broadcast %cst_28 : f32 to vector<8x128xf32>
    %102 = arith.subf %101, %100 : vector<8x128xf32>
    %103 = math.exp %102 : vector<8x128xf32>
    %104 = math.log1p %103 : vector<8x128xf32>
    %105 = arith.addf %96, %104 : vector<8x128xf32>
    %106 = arith.select %98, %99, %105 : vector<8x128xi1>, vector<8x128xf32>
    %c2_i32_29 = arith.constant 2 : i32
    %107 = tpu.dynamic_rotate %106 by %c2_i32_29 dim 0 : vector<8x128xf32>, i32 -> vector<8x128xf32>
    %c2_i32_30 = arith.constant 2 : i32
    %108 = vector.broadcast %c2_i32_30 : i32 to vector<8x1xi32>
    %109 = arith.cmpi slt, %63, %108 : vector<8x1xi32>
    %cst_31 = arith.constant -1.000000e+30 : f32
    %110 = vector.shape_cast %109 : vector<8x1xi1> to vector<8x1xi1>
    %111 = vector.broadcast %110 : vector<8x1xi1> to vector<8x128xi1>
    %112 = vector.broadcast %cst_31 : f32 to vector<8x128xf32>
    %113 = arith.select %111, %112, %107 : vector<8x128xi1>, vector<8x128xf32>
    %114 = arith.maximumf %106, %113 : vector<8x128xf32>
    %115 = arith.subf %106, %113 : vector<8x128xf32>
    %116 = arith.cmpf one, %115, %115 : vector<8x128xf32>
    %117 = arith.addf %106, %113 : vector<8x128xf32>
    %118 = math.absf %115 : vector<8x128xf32>
    %cst_32 = arith.constant 0.000000e+00 : f32
    %119 = vector.broadcast %cst_32 : f32 to vector<8x128xf32>
    %120 = arith.subf %119, %118 : vector<8x128xf32>
    %121 = math.exp %120 : vector<8x128xf32>
    %122 = math.log1p %121 : vector<8x128xf32>
    %123 = arith.addf %114, %122 : vector<8x128xf32>
    %124 = arith.select %116, %117, %123 : vector<8x128xi1>, vector<8x128xf32>
    %c4_i32_33 = arith.constant 4 : i32
    %125 = tpu.dynamic_rotate %124 by %c4_i32_33 dim 0 : vector<8x128xf32>, i32 -> vector<8x128xf32>
    %c4_i32_34 = arith.constant 4 : i32
    %126 = vector.broadcast %c4_i32_34 : i32 to vector<8x1xi32>
    %127 = arith.cmpi slt, %63, %126 : vector<8x1xi32>
    %cst_35 = arith.constant -1.000000e+30 : f32
    %128 = vector.shape_cast %127 : vector<8x1xi1> to vector<8x1xi1>
    %129 = vector.broadcast %128 : vector<8x1xi1> to vector<8x128xi1>
    %130 = vector.broadcast %cst_35 : f32 to vector<8x128xf32>
    %131 = arith.select %129, %130, %125 : vector<8x128xi1>, vector<8x128xf32>
    %132 = arith.maximumf %124, %131 : vector<8x128xf32>
    %133 = arith.subf %124, %131 : vector<8x128xf32>
    %134 = arith.cmpf one, %133, %133 : vector<8x128xf32>
    %135 = arith.addf %124, %131 : vector<8x128xf32>
    %136 = math.absf %133 : vector<8x128xf32>
    %cst_36 = arith.constant 0.000000e+00 : f32
    %137 = vector.broadcast %cst_36 : f32 to vector<8x128xf32>
    %138 = arith.subf %137, %136 : vector<8x128xf32>
    %139 = math.exp %138 : vector<8x128xf32>
    %140 = math.log1p %139 : vector<8x128xf32>
    %141 = arith.addf %132, %140 : vector<8x128xf32>
    %142 = arith.select %134, %135, %141 : vector<8x128xi1>, vector<8x128xf32>
    %c0_37 = arith.constant 0 : index
    %c0_38 = arith.constant 0 : index
    %143 = vector.load %arg7[%c0_37, %c0_38] : memref<1x128xf32, #tpu.memory_space<vmem>>, vector<1x128xf32>
    %144 = vector.broadcast %143 : vector<1x128xf32> to vector<8x128xf32>
    %145 = arith.maximumf %144, %142 : vector<8x128xf32>
    %146 = vector.broadcast %143 : vector<1x128xf32> to vector<8x128xf32>
    %147 = arith.subf %146, %142 : vector<8x128xf32>
    %148 = arith.cmpf one, %147, %147 : vector<8x128xf32>
    %149 = vector.broadcast %143 : vector<1x128xf32> to vector<8x128xf32>
    %150 = arith.addf %149, %142 : vector<8x128xf32>
    %151 = math.absf %147 : vector<8x128xf32>
    %cst_39 = arith.constant 0.000000e+00 : f32
    %152 = vector.broadcast %cst_39 : f32 to vector<8x128xf32>
    %153 = arith.subf %152, %151 : vector<8x128xf32>
    %154 = math.exp %153 : vector<8x128xf32>
    %155 = math.log1p %154 : vector<8x128xf32>
    %156 = arith.addf %145, %155 : vector<8x128xf32>
    %157 = arith.select %148, %150, %156 : vector<8x128xi1>, vector<8x128xf32>
    %158 = arith.addf %87, %157 : vector<8x128xf32>
    %159 = math.exp %158 : vector<8x128xf32>
    %c0_40 = arith.constant 0 : index
    %c0_41 = arith.constant 0 : index
    %160 = vector.load %arg6[%c0_40, %c0_41] : memref<8x128xf32, #tpu.memory_space<vmem>>, vector<8x128xf32>
    tpu.vector_store %arg6[%c0_40, %c0_41], %159 {strides = array<i32>} : memref<8x128xf32, #tpu.memory_space<vmem>>, vector<8x128xf32>,
    %161 = vector.extract_strided_slice %158 {offsets = [7, 0], sizes = [1, 128], strides = [1, 1]} : vector<8x128xf32> to vector<1x128xf32>
    %c0_42 = arith.constant 0 : index
    %c0_43 = arith.constant 0 : index
    %162 = vector.load %arg7[%c0_42, %c0_43] : memref<1x128xf32, #tpu.memory_space<vmem>>, vector<1x128xf32>
    tpu.vector_store %arg7[%c0_42, %c0_43], %161 {strides = array<i32>} : memref<1x128xf32, #tpu.memory_space<vmem>>, vector<1x128xf32>,
    return
  }
  func.func @transform_0(%arg0: i32, %arg1: i32, %arg2: i32) -> (i32, i32) {
    %c1_i32 = arith.constant 1 : i32
    %0 = arith.muli %arg1, %c1_i32 : i32
    %1 = arith.addi %0, %arg2 : i32
    %c0_i32 = arith.constant 0 : i32
    %c0_i32_0 = arith.constant 0 : i32
    return %1, %c0_i32 : i32, i32
  }
  func.func @transform_1(%arg0: i32, %arg1: i32, %arg2: i32) -> (i32, i32) {
    %c0_i32 = arith.constant 0 : i32
    %c0_i32_0 = arith.constant 0 : i32
    return %c0_i32, %arg0 : i32, i32
  }
  func.func @transform_2(%arg0: i32, %arg1: i32, %arg2: i32) -> (i32, i32) {
    %c1_i32 = arith.constant 1 : i32
    %0 = arith.muli %arg1, %c1_i32 : i32
    %1 = arith.addi %0, %arg2 : i32
    %c0_i32 = arith.constant 0 : i32
    %c0_i32_0 = arith.constant 0 : i32
    return %1, %c0_i32 : i32, i32
  }
  func.func @transform_3(%arg0: i32, %arg1: i32, %arg2: i32) -> (i32, i32) {
    %c1_i32 = arith.constant 1 : i32
    %0 = arith.muli %arg1, %c1_i32 : i32
    %1 = arith.addi %0, %arg2 : i32
    %c0_i32 = arith.constant 0 : i32
    return %1, %arg0 : i32, i32
  }
}

module attributes {stable_mosaic.version = 11 : i64} {
  func.func @_min_gru_kernel(%arg0: i32, %arg1: i32, %arg2: i32, %arg3: memref<8x128xbf16, #tpu.memory_space<vmem>>, %arg4: memref<128x256xbf16, #tpu.memory_space<vmem>>, %arg5: memref<8x1xf32, #tpu.memory_space<vmem>>, %arg6: memref<8x128xf32, #tpu.memory_space<vmem>>, %arg7: memref<1x128xf32, #tpu.memory_space<vmem>>) attributes {dimension_semantics = [#tpu.dimension_semantics<parallel>, #tpu.dimension_semantics<parallel>, #tpu.dimension_semantics<arbitrary>], iteration_bounds = array<i64: 1, 2, 1>, scalar_prefetch = 0 : i64, scratch_operands = 1 : i64, tpu.core_type = #tpu.core_type<tc>, window_params = [{transform_indices = @transform_0, window_bounds = array<i64: 8, 128>}, {transform_indices = @transform_1, window_bounds = array<i64: 128, 256>}, {transform_indices = @transform_2, window_bounds = array<i64: 8, 1>}, {transform_indices = @transform_3, window_bounds = array<i64: 8, 128>}]} {
    %c0_i32 = arith.constant 0 : i32
    %0 = arith.cmpi eq, %arg2, %c0_i32 : i32
    %1 = arith.extui %0 : i1 to i32
    %c0_i32_0 = arith.constant 0 : i32
    %2 = arith.cmpi ne, %1, %c0_i32_0 : i32
    scf.if %2 {
      %cst_44 = arith.constant -1.000000e+30 : f32
      %163 = vector.broadcast %cst_44 : f32 to vector<1x128xf32>
      %c0_45 = arith.constant 0 : index
      %c0_46 = arith.constant 0 : index
      %164 = vector.load %arg7[%c0_45, %c0_46] : memref<1x128xf32, #tpu.memory_space<vmem>>, vector<1x128xf32>
      tpu.vector_store %arg7[%c0_45, %c0_46], %163 {strides = array<i32>} : memref<1x128xf32, #tpu.memory_space<vmem>>, vector<1x128xf32>,
    } else {
    }
    %c0 = arith.constant 0 : index
    %c0_1 = arith.constant 0 : index
    %3 = vector.load %arg3[%c0, %c0_1] : memref<8x128xbf16, #tpu.memory_space<vmem>>, vector<8x128xbf16>
    %c0_2 = arith.constant 0 : index
    %c0_3 = arith.constant 0 : index
    %4 = vector.load %arg4[%c0_2, %c0_3] : memref<128x256xbf16, #tpu.memory_space<vmem>>, vector<128x256xbf16>
    %cst = arith.constant dense<0.000000e+00> : vector<8x256xf32>
    %5 = tpu.matmul %3, %4, %cst {dimension_numbers = #tpu.dot_dimension_numbers<[1], [0], [0], [1], [0, 0, 1, 1], [], []>} : vector<8x128xbf16>, vector<128x256xbf16>, vector<8x256xf32> -> vector<8x256xf32>
    %6 = vector.extract_strided_slice %5 {offsets = [0, 0], sizes = [8, 128], strides = [1, 1]} : vector<8x256xf32> to vector<8x128xf32>
    %7 = vector.extract_strided_slice %5 {offsets = [0, 128], sizes = [8, 128], strides = [1, 1]} : vector<8x256xf32> to vector<8x128xf32>
    %cst_4 = arith.constant 0.000000e+00 : f32
    %8 = vector.broadcast %cst_4 : f32 to vector<8x128xf32>
    %9 = arith.maximumf %7, %8 : vector<8x128xf32>
    %10 = vector.broadcast %cst_4 : f32 to vector<8x128xf32>
    %11 = arith.subf %7, %10 : vector<8x128xf32>
    %12 = arith.cmpf one, %11, %11 : vector<8x128xf32>
    %13 = vector.broadcast %cst_4 : f32 to vector<8x128xf32>
    %14 = arith.addf %7, %13 : vector<8x128xf32>
    %15 = math.absf %11 : vector<8x128xf32>
    %cst_5 = arith.constant 0.000000e+00 : f32
    %16 = vector.broadcast %cst_5 : f32 to vector<8x128xf32>
    %17 = arith.subf %16, %15 : vector<8x128xf32>
    %18 = math.exp %17 : vector<8x128xf32>
    %19 = math.log1p %18 : vector<8x128xf32>
    %20 = arith.addf %9, %19 : vector<8x128xf32>
    %21 = arith.select %12, %14, %20 : vector<8x128xi1>, vector<8x128xf32>
    %cst_6 = arith.constant 0.000000e+00 : f32
    %22 = vector.broadcast %cst_6 : f32 to vector<8x128xf32>
    %23 = arith.subf %22, %21 : vector<8x128xf32>
    %24 = arith.addf %7, %23 : vector<8x128xf32>
    %cst_7 = arith.constant 0.000000e+00 : f32
    %25 = vector.broadcast %cst_7 : f32 to vector<8x128xf32>
    %26 = arith.cmpf oge, %6, %25 : vector<8x128xf32>
    %cst_8 = arith.constant 0.000000e+00 : f32
    %27 = vector.broadcast %cst_8 : f32 to vector<8x128xf32>
    %28 = arith.maximumf %6, %27 : vector<8x128xf32>
    %cst_9 = arith.constant 5.000000e-01 : f32
    %29 = vector.broadcast %cst_9 : f32 to vector<8x128xf32>
    %30 = arith.addf %28, %29 : vector<8x128xf32>
    %31 = math.log %30 : vector<8x128xf32>
    %cst_10 = arith.constant 0.000000e+00 : f32
    %32 = vector.broadcast %cst_10 : f32 to vector<8x128xf32>
    %33 = arith.subf %32, %6 : vector<8x128xf32>
    %cst_11 = arith.constant 0.000000e+00 : f32
    %34 = vector.broadcast %cst_11 : f32 to vector<8x128xf32>
    %35 = arith.maximumf %33, %34 : vector<8x128xf32>
    %36 = vector.broadcast %cst_11 : f32 to vector<8x128xf32>
    %37 = arith.subf %33, %36 : vector<8x128xf32>
    %38 = arith.cmpf one, %37, %37 : vector<8x128xf32>
    %39 = vector.broadcast %cst_11 : f32 to vector<8x128xf32>
    %40 = arith.addf %33, %39 : vector<8x128xf32>
    %41 = math.absf %37 : vector<8x128xf32>
    %cst_12 = arith.constant 0.000000e+00 : f32
    %42 = vector.broadcast %cst_12 : f32 to vector<8x128xf32>
    %43 = arith.subf %42, %41 : vector<8x128xf32>
    %44 = math.exp %43 : vector<8x128xf32>
    %45 = math.log1p %44 : vector<8x128xf32>
    %46 = arith.addf %35, %45 : vector<8x128xf32>
    %47 = arith.select %38, %40, %46 : vector<8x128xi1>, vector<8x128xf32>
    %cst_13 = arith.constant 0.000000e+00 : f32
    %48 = vector.broadcast %cst_13 : f32 to vector<8x128xf32>
    %49 = arith.subf %48, %47 : vector<8x128xf32>
    %50 = arith.select %26, %31, %49 : vector<8x128xi1>, vector<8x128xf32>
    %51 = arith.addf %24, %50 : vector<8x128xf32>
    %c0_14 = arith.constant 0 : index
    %c0_15 = arith.constant 0 : index
    %52 = vector.load %arg5[%c0_14, %c0_15] : memref<8x1xf32, #tpu.memory_space<vmem>>, vector<8x1xf32>
    %cst_16 = arith.constant 5.000000e-01 : f32
    %53 = vector.broadcast %cst_16 : f32 to vector<8x1xf32>
    %54 = arith.cmpf ogt, %52, %53 : vector<8x1xf32>
    %cst_17 = arith.constant -1.000000e+02 : f32
    %55 = vector.shape_cast %54 : vector<8x1xi1> to vector<8x1xi1>
    %56 = vector.broadcast %55 : vector<8x1xi1> to vector<8x128xi1>
    %57 = vector.broadcast %cst_17 : f32 to vector<8x128xf32>
    %58 = arith.select %56, %57, %23 : vector<8x128xi1>, vector<8x128xf32>
    %cst_18 = arith.constant -1.000000e+02 : f32
    %59 = vector.shape_cast %54 : vector<8x1xi1> to vector<8x1xi1>
    %60 = vector.broadcast %59 : vector<8x1xi1> to vector<8x128xi1>
    %61 = vector.broadcast %cst_18 : f32 to vector<8x128xf32>
    %62 = arith.select %60, %61, %51 : vector<8x128xi1>, vector<8x128xf32>
    %63 = tpu.iota {dimensions = array<i32: 0>} : vector<8x1xi32>
    %c1_i32 = arith.constant 1 : i32
    %64 = tpu.dynamic_rotate %58 by %c1_i32 dim 0 : vector<8x128xf32>, i32 -> vector<8x128xf32>
    %c1_i32_19 = arith.constant 1 : i32
    %65 = vector.broadcast %c1_i32_19 : i32 to vector<8x1xi32>
    %66 = arith.cmpi slt, %63, %65 : vector<8x1xi32>
    %cst_20 = arith.constant 0.000000e+00 : f32
    %67 = vector.shape_cast %66 : vector<8x1xi1> to vector<8x1xi1>
    %68 = vector.broadcast %67 : vector<8x1xi1> to vector<8x128xi1>
    %69 = vector.broadcast %cst_20 : f32 to vector<8x128xf32>
    %70 = arith.select %68, %69, %64 : vector<8x128xi1>, vector<8x128xf32>
    %71 = arith.addf %58, %70 : vector<8x128xf32>
    %c2_i32 = arith.constant 2 : i32
    %72 = tpu.dynamic_rotate %71 by %c2_i32 dim 0 : vector<8x128xf32>, i32 -> vector<8x128xf32>
    %c2_i32_21 = arith.constant 2 : i32
    %73 = vector.broadcast %c2_i32_21 : i32 to vector<8x1xi32>
    %74 = arith.cmpi slt, %63, %73 : vector<8x1xi32>
    %cst_22 = arith.constant 0.000000e+00 : f32
    %75 = vector.shape_cast %74 : vector<8x1xi1> to vector<8x1xi1>
    %76 = vector.broadcast %75 : vector<8x1xi1> to vector<8x128xi1>
    %77 = vector.broadcast %cst_22 : f32 to vector<8x128xf32>
    %78 = arith.select %76, %77, %72 : vector<8x128xi1>, vector<8x128xf32>
    %79 = arith.addf %71, %78 : vector<8x128xf32>
    %c4_i32 = arith.constant 4 : i32
    %80 = tpu.dynamic_rotate %79 by %c4_i32 dim 0 : vector<8x128xf32>, i32 -> vector<8x128xf32>
    %c4_i32_23 = arith.constant 4 : i32
    %81 = vector.broadcast %c4_i32_23 : i32 to vector<8x1xi32>
    %82 = arith.cmpi slt, %63, %81 : vector<8x1xi32>
    %cst_24 = arith.constant 0.000000e+00 : f32
    %83 = vector.shape_cast %82 : vector<8x1xi1> to vector<8x1xi1>
    %84 = vector.broadcast %83 : vector<8x1xi1> to vector<8x128xi1>
    %85 = vector.broadcast %cst_24 : f32 to vector<8x128xf32>
    %86 = arith.select %84, %85, %80 : vector<8x128xi1>, vector<8x128xf32>
    %87 = arith.addf %79, %86 : vector<8x128xf32>
    %88 = arith.subf %62, %87 : vector<8x128xf32>
    %c1_i32_25 = arith.constant 1 : i32
    %89 = tpu.dynamic_rotate %88 by %c1_i32_25 dim 0 : vector<8x128xf32>, i32 -> vector<8x128xf32>
    %c1_i32_26 = arith.constant 1 : i32
    %90 = vector.broadcast %c1_i32_26 : i32 to vector<8x1xi32>
    %91 = arith.cmpi slt, %63, %90 : vector<8x1xi32>
    %cst_27 = arith.constant -1.000000e+30 : f32
    %92 = vector.shape_cast %91 : vector<8x1xi1> to vector<8x1xi1>
    %93 = vector.broadcast %92 : vector<8x1xi1> to vector<8x128xi1>
    %94 = vector.broadcast %cst_27 : f32 to vector<8x128xf32>
    %95 = arith.select %93, %94, %89 : vector<8x128xi1>, vector<8x128xf32>
    %96 = arith.maximumf %88, %95 : vector<8x128xf32>
    %97 = arith.subf %88, %95 : vector<8x128xf32>
    %98 = arith.cmpf one, %97, %97 : vector<8x128xf32>
    %99 = arith.addf %88, %95 : vector<8x128xf32>
    %100 = math.absf %97 : vector<8x128xf32>
    %cst_28 = arith.constant 0.000000e+00 : f32
    %101 = vector.broadcast %cst_28 : f32 to vector<8x128xf32>
    %102 = arith.subf %101, %100 : vector<8x128xf32>
    %103 = math.exp %102 : vector<8x128xf32>
    %104 = math.log1p %103 : vector<8x128xf32>
    %105 = arith.addf %96, %104 : vector<8x128xf32>
    %106 = arith.select %98, %99, %105 : vector<8x128xi1>, vector<8x128xf32>
    %c2_i32_29 = arith.constant 2 : i32
    %107 = tpu.dynamic_rotate %106 by %c2_i32_29 dim 0 : vector<8x128xf32>, i32 -> vector<8x128xf32>
    %c2_i32_30 = arith.constant 2 : i32
    %108 = vector.broadcast %c2_i32_30 : i32 to vector<8x1xi32>
    %109 = arith.cmpi slt, %63, %108 : vector<8x1xi32>
    %cst_31 = arith.constant -1.000000e+30 : f32
    %110 = vector.shape_cast %109 : vector<8x1xi1> to vector<8x1xi1>
    %111 = vector.broadcast %110 : vector<8x1xi1> to vector<8x128xi1>
    %112 = vector.broadcast %cst_31 : f32 to vector<8x128xf32>
    %113 = arith.select %111, %112, %107 : vector<8x128xi1>, vector<8x128xf32>
    %114 = arith.maximumf %106, %113 : vector<8x128xf32>
    %115 = arith.subf %106, %113 : vector<8x128xf32>
    %116 = arith.cmpf one, %115, %115 : vector<8x128xf32>
    %117 = arith.addf %106, %113 : vector<8x128xf32>
    %118 = math.absf %115 : vector<8x128xf32>
    %cst_32 = arith.constant 0.000000e+00 : f32
    %119 = vector.broadcast %cst_32 : f32 to vector<8x128xf32>
    %120 = arith.subf %119, %118 : vector<8x128xf32>
    %121 = math.exp %120 : vector<8x128xf32>
    %122 = math.log1p %121 : vector<8x128xf32>
    %123 = arith.addf %114, %122 : vector<8x128xf32>
    %124 = arith.select %116, %117, %123 : vector<8x128xi1>, vector<8x128xf32>
    %c4_i32_33 = arith.constant 4 : i32
    %125 = tpu.dynamic_rotate %124 by %c4_i32_33 dim 0 : vector<8x128xf32>, i32 -> vector<8x128xf32>
    %c4_i32_34 = arith.constant 4 : i32
    %126 = vector.broadcast %c4_i32_34 : i32 to vector<8x1xi32>
    %127 = arith.cmpi slt, %63, %126 : vector<8x1xi32>
    %cst_35 = arith.constant -1.000000e+30 : f32
    %128 = vector.shape_cast %127 : vector<8x1xi1> to vector<8x1xi1>
    %129 = vector.broadcast %128 : vector<8x1xi1> to vector<8x128xi1>
    %130 = vector.broadcast %cst_35 : f32 to vector<8x128xf32>
    %131 = arith.select %129, %130, %125 : vector<8x128xi1>, vector<8x128xf32>
    %132 = arith.maximumf %124, %131 : vector<8x128xf32>
    %133 = arith.subf %124, %131 : vector<8x128xf32>
    %134 = arith.cmpf one, %133, %133 : vector<8x128xf32>
    %135 = arith.addf %124, %131 : vector<8x128xf32>
    %136 = math.absf %133 : vector<8x128xf32>
    %cst_36 = arith.constant 0.000000e+00 : f32
    %137 = vector.broadcast %cst_36 : f32 to vector<8x128xf32>
    %138 = arith.subf %137, %136 : vector<8x128xf32>
    %139 = math.exp %138 : vector<8x128xf32>
    %140 = math.log1p %139 : vector<8x128xf32>
    %141 = arith.addf %132, %140 : vector<8x128xf32>
    %142 = arith.select %134, %135, %141 : vector<8x128xi1>, vector<8x128xf32>
    %c0_37 = arith.constant 0 : index
    %c0_38 = arith.constant 0 : index
    %143 = vector.load %arg7[%c0_37, %c0_38] : memref<1x128xf32, #tpu.memory_space<vmem>>, vector<1x128xf32>
    %144 = vector.broadcast %143 : vector<1x128xf32> to vector<8x128xf32>
    %145 = arith.maximumf %144, %142 : vector<8x128xf32>
    %146 = vector.broadcast %143 : vector<1x128xf32> to vector<8x128xf32>
    %147 = arith.subf %146, %142 : vector<8x128xf32>
    %148 = arith.cmpf one, %147, %147 : vector<8x128xf32>
    %149 = vector.broadcast %143 : vector<1x128xf32> to vector<8x128xf32>
    %150 = arith.addf %149, %142 : vector<8x128xf32>
    %151 = math.absf %147 : vector<8x128xf32>
    %cst_39 = arith.constant 0.000000e+00 : f32
    %152 = vector.broadcast %cst_39 : f32 to vector<8x128xf32>
    %153 = arith.subf %152, %151 : vector<8x128xf32>
    %154 = math.exp %153 : vector<8x128xf32>
    %155 = math.log1p %154 : vector<8x128xf32>
    %156 = arith.addf %145, %155 : vector<8x128xf32>
    %157 = arith.select %148, %150, %156 : vector<8x128xi1>, vector<8x128xf32>
    %158 = arith.addf %87, %157 : vector<8x128xf32>
    %159 = math.exp %158 : vector<8x128xf32>
    %c0_40 = arith.constant 0 : index
    %c0_41 = arith.constant 0 : index
    %160 = vector.load %arg6[%c0_40, %c0_41] : memref<8x128xf32, #tpu.memory_space<vmem>>, vector<8x128xf32>
    tpu.vector_store %arg6[%c0_40, %c0_41], %159 {strides = array<i32>} : memref<8x128xf32, #tpu.memory_space<vmem>>, vector<8x128xf32>,
    %161 = vector.extract_strided_slice %158 {offsets = [7, 0], sizes = [1, 128], strides = [1, 1]} : vector<8x128xf32> to vector<1x128xf32>
    %c0_42 = arith.constant 0 : index
    %c0_43 = arith.constant 0 : index
    %162 = vector.load %arg7[%c0_42, %c0_43] : memref<1x128xf32, #tpu.memory_space<vmem>>, vector<1x128xf32>
    tpu.vector_store %arg7[%c0_42, %c0_43], %161 {strides = array<i32>} : memref<1x128xf32, #tpu.memory_space<vmem>>, vector<1x128xf32>,
    return
  }
  func.func @transform_0(%arg0: i32, %arg1: i32, %arg2: i32) -> (i32, i32) {
    %c1_i32 = arith.constant 1 : i32
    %0 = arith.muli %arg1, %c1_i32 : i32
    %1 = arith.addi %0, %arg2 : i32
    %c0_i32 = arith.constant 0 : i32
    %c0_i32_0 = arith.constant 0 : i32
    return %1, %c0_i32 : i32, i32
  }
  func.func @transform_1(%arg0: i32, %arg1: i32, %arg2: i32) -> (i32, i32) {
    %c0_i32 = arith.constant 0 : i32
    %c0_i32_0 = arith.constant 0 : i32
    return %c0_i32, %arg0 : i32, i32
  }
  func.func @transform_2(%arg0: i32, %arg1: i32, %arg2: i32) -> (i32, i32) {
    %c1_i32 = arith.constant 1 : i32
    %0 = arith.muli %arg1, %c1_i32 : i32
    %1 = arith.addi %0, %arg2 : i32
    %c0_i32 = arith.constant 0 : i32
    %c0_i32_0 = arith.constant 0 : i32
    return %1, %c0_i32 : i32, i32
  }
  func.func @transform_3(%arg0: i32, %arg1: i32, %arg2: i32) -> (i32, i32) {
    %c1_i32 = arith.constant 1 : i32
    %0 = arith.muli %arg1, %c1_i32 : i32
    %1 = arith.addi %0, %arg2 : i32
    %c0_i32 = arith.constant 0 : i32
    return %1, %arg0 : i32, i32
  }
}

</mosaic_0001>

<bundles_post_ra>
// kernel: tpu_custom_call.1
= control target key start
LH: loop header
LB: loop body
LE: loop exit
PB: predicated region body
PF: predicated region fallthrough
CT: control target
= control target key end

     0   :  { %8 = vsyncpa [#allocation4], 0  ;;  %s1123_s0 = inlined_call_operand.vmem [shape: bf16[16,128], index: 0, kind: input, shape index: {}]   ;;  %s1124_s1 = inlined_call_operand.hbm [shape: bf16[128,256], index: 1, kind: input, shape index: {}]   ;;  %s1125_s2 = inlined_call_operand.vmem [shape: f32[16,1], index: 2, kind: input, shape index: {}]   ;;  %s1126_s3 = inlined_call_operand.hbm [shape: f32[16,128], index: 3, kind: output, shape index: {}]  }
   0x1   :  { %9 = vsyncpa [#allocation5], 0 }
   0x2   :  { %11 = vsyncpa [#allocation5 + $0x1], 0  ;;  %s962_s12 = smov 0   ;;  %s964_s13 = smov 0  }
   0x3   :  { %s966_s14 = smov 0   ;;  %s968_s15 = smov 0  }
   0x4   :  { %s970_s16 = smov 0   ;;  %s972_s17 = smov 0  }
   0x5 LB: > { %s674_s18 = sadd.s32 4294967295, %s934_s17   ;;  %s675_s19 = sadd.s32 4294967294, %s934_s17   ;;  %s934_s17 = sphi %s972_s17, %s17_s17   ;;  %s930_s16 = sphi %s970_s16, %s1135_s16   ;;  %s926_s15 = sphi %s968_s15, %s1134_s15   ;;  %s922_s14 = sphi %s966_s14, %s1133_s14   ;;  %s918_s13 = sphi %s964_s13, %s1132_s13   ;;  %s914_s12 = sphi %s962_s12, %s1131_s12  }
   0x6   : > { %s32_s20 = sadd.s32 1, %s930_s16  ;;  %s129_s21 = sadd.s32 1, %s922_s14 }
   0x7   : > { %p34_p0 = scmp.ge.s32.totalorder %s32_s20, 2  ;;  %p139_p1 = scmp.ne.s32.totalorder %s922_s14, %s918_s13 }
   0x8   : > { %p140_p2 = scmp.eq.s32.totalorder %s674_s18, 1  ;;  %p145_p3 = scmp.ne.s32.totalorder %s918_s13, %s914_s12 }
   0x9   : > { %s1137_s20 = smov (%p34_p0, %s32_s20), 0  ;;  %p146_p5 = scmp.eq.s32.totalorder %s675_s19, 1 }
   0xa   : > { %p1002_p4 = por %p140_p2, %p139_p1  ;;  %s124_s23 = ssub.s32 %s930_s16, %s1137_s20 }
   0xb   : > { %p676_p6 = scmp.ge.s32.totalorder %s934_s17, 1  ;;  %p127_p7 = scmp.eq.s32.totalorder %s124_s23, 0 }
   0xc   : > { %p1009_p8 = por %p146_p5, %p145_p3  ;;  %p153_p9 = scmp.lt.s32.totalorder %s934_s17, 3 }
   0xd   : > { %s1015_s25 = scalar_select %p127_p7, %s922_s14, %s129_s21  }
   0xe   : > { %p1017_p10 = pnand %p676_p6, %p153_p9  ;;  %p1021_p11 = scmp.eq.s32.totalorder %s674_s18, 0 }
   0xf   : > { %s936_s28 = smov [#allocation3]  }
  0x10   : > { %p711_p12 = pneg %p1017_p10  ;;  %s168_s29 = sshll.u32 %s936_s28, 4  ;;  %s169_s29 = int_to_ptr.vmem [resolvable:$true] %s168_s29 }
  0x11   : > { %s839_s30 = scalar_lea.vmem %s169_s29, 2048  ;;  %p847_p5 = scmp.lt.s32.totalorder %s169_s29, %s169_s29 }
  0x12   : > { %p712_p13 = pnand %p1021_p11, %p711_p12  ;;  %p840_p1 = scmp.ne.s32.totalorder %s169_s29, %s839_s30 }
  0x13   : > { %p848_p6 = scmp.lt.s32.totalorder %s839_s30, %s839_s30 }
  0x14   : > { %p830_p0 = pneg %p712_p13 }
  0x15   : > { %p849_p7 = por %p848_p6, %p847_p5 }
  0x16   : > { %p842_p2 = pnand %p840_p1, %p830_p0 }
  0x18   : > { %p843_p3 = pneg %p842_p2 }
  0x1a   : > { %p850_p9 = pnand %p849_p7, %p843_p3 }
  0x1c   : > { %853 = shalt.err (!%p850_p9)
}
  0x1d   : > { %s937_s4 = smov 128   ;;  %s938_s5 = smov 8  }
  0x1e   : > { %714 = dma.hbm_to_vmem [thread:$0]  (!%p712_p13), %s1124_s1, 2048, %s169_s29, [#allocation4], %s937_s4, %s937_s4, %s938_s5  }
  0x1f   : > { %202 = sbr.rel (%p1017_p10) target bundleno = 545 (0x221), region = 32 }
  0x24   : > { %905 = dma.done.wait (%p1021_p11), [#allocation4], 2048  }
  0x25   : > { %907 = vsyncadd (%p1021_p11), [#allocation4], 4294965248  ;;  %v939_v0 = vmov 0   ;;  %p232_p12 = scmp.lt.s32.totalorder %s926_s15, 1  ;;  %v776_v1 = vld [vmem:[#allocation3 + $0x74] ss:$8 sps:$4 sm:$0xff]   ;;  %v445_v47 = vlaneseq }
  0x26   : > { %380 = vmatprep.mubr.bf16.mxu0 %v939_v0  ;;  %775 = vset.pattern.permute.xlu0 %v939_v0  ;;  %v778_v2 = vld [vmem:[#allocation3 + $0x70] ss:$8 sps:$4 sm:$0xff]   ;;  %v779_v3 = vld [vmem:[#allocation3 + $0x64] ss:$8 sps:$4 sm:$0xff]   ;;  %v781_v4 = vld [vmem:[#allocation3 + $0x60] ss:$8 sps:$4 sm:$0xff]  }
  0x27   : > { %348 = vmatprep.subr.bf16.mxu0 %v776_v1  ;;  %s1040_s8 = scalar_select %p232_p12, %s926_s15, 1  ;;  %v782_v5 = vld [vmem:[#allocation3 + $0x54] ss:$8 sps:$4 sm:$0xff]   ;;  %v784_v6 = vld [vmem:[#allocation3 + $0x50] ss:$8 sps:$4 sm:$0xff]   ;;  %v1054_v57 = vshrl.u32 %v445_v47, 7 }
  0x28   : > { %349 = vmatpush1.bf16.msra.mxu0 %v778_v2  ;;  %v785_v7 = vld [vmem:[#allocation3 + $0x44] ss:$8 sps:$4 sm:$0xff]   ;;  %v787_v8 = vld [vmem:[#allocation3 + $0x40] ss:$8 sps:$4 sm:$0xff]   ;;  %v788_v10 = vld [vmem:[#allocation3 + $0x34] ss:$8 sps:$4 sm:$0xff]  }
  0x29   : > { %350 = vmatprep.subr.bf16.mxu0 %v779_v3  ;;  %s683_s9 = sshll.u32 %s1040_s8, 3  ;;  %v790_v12 = vld [vmem:[#allocation3 + $0x30] ss:$8 sps:$4 sm:$0xff]   ;;  %v791_v13 = vld [vmem:[#allocation3 + $0x24] ss:$8 sps:$4 sm:$0xff]   ;;  %s682_s19 = sshll.u32 %s1040_s8, 2 }
  0x2a   : > { %s242_s18 = scalar_lea.vmem %s1125_s2, %s683_s9  ;;  %v793_v14 = vld [vmem:[#allocation3 + $0x20] ss:$8 sps:$4 sm:$0xff]   ;;  %v794_v15 = vld [vmem:[#allocation3 + $0x14] ss:$8 sps:$4 sm:$0xff]   ;;  %v796_v16 = vld [vmem:[#allocation3 + $0x10] ss:$8 sps:$4 sm:$0xff]   ;;  %s235_s26 = scalar_lea.vmem %s1123_s0, %s682_s19 }
  0x2b   : > { %v436_v9 = vld [vmem:[%s242_s18] sm:$0xff]  ;;  %v940_v20 = vmov -1e+30   ;;  %vm448_vm5 = vcmp.lt.s32.totalorder %v1054_v57, 1  ;;  %vm454_vm7 = vcmp.lt.s32.totalorder %v1054_v57, 2  ;;  %vm460_vm9 = vcmp.lt.s32.totalorder %v1054_v57, 4 }
  0x2c   : > { %351 = vmatpush1.bf16.msra.mxu0 %v781_v4  ;;  %vm437_vm0 = vcmp.gt.f32.partialorder %v436_v9, 0.5  ;;  %v797_v17 = vld [vmem:[#allocation3 + $0x4] ss:$8 sps:$4 sm:$0xff]   ;;  %v799_v18 = vld [vmem:[#allocation3] ss:$8 sps:$4 sm:$0xff]   ;;  %s228_s27 = sand.u32 1, %s918_s13  }
  0x2d   : > { %352 = vmatprep.subr.bf16.mxu0 %v782_v5  ;;  %v438_v11 = vsel %vm437_vm0, 1, %v939_v0  ;;  %v251_v19 = vld [vmem:[%s235_s26] sm:$0xf]  ;;  %250 = vst [vmem:[#allocation2] sm:$0x1] %v940_v20  ;;  %s681_s28 = sshll.u32 %s228_s27, 3 }
  0x2e   : > { %440 = vperm.xlu0 %775, %v438_v11   ;;  %s702_s29 = sshll.u32 %s926_s15, 7  ;;  %s230_s30 = scalar_lea.vmem [#allocation6], %s681_s28 }
  0x2f   : > { %s576_s4 = sshll.u32 %s230_s30, 4  ;;  %s1083_s7 = scalar_lea.hbm %s1126_s3, %s702_s29  ;;  %s577_s4 = int_to_ptr.vmem [resolvable:$true] %s576_s4 }
  0x30   : > { %353 = vmatpush1.bf16.msra.mxu0 %v784_v6  ;;  %s561_s8 = scalar_lea.sflag [#allocation5], %s228_s27  ;;  %s854_s9 = scalar_lea.vmem %s577_s4, 128 }
  0x31   : > { %354 = vmatprep.subr.bf16.mxu0 %v785_v7  ;;  %p855_p10 = scmp.ne.s32.totalorder %s577_s4, %s854_s9  ;;  %s941_s10 = smov [#allocation6]  }
  0x32   : > { %s858_s11 = sshll.u32 %s941_s10, 4  ;;  %s859_s11 = int_to_ptr.vmem [resolvable:$false] %s858_s11 }
  0x33   : > { %p856_p11 = pnand %p855_p10, %p1002_p4  ;;  %s860_s15 = scalar_lea.vmem %s859_s11, 256 }
  0x34   : > { %355 = vmatpush1.bf16.msra.mxu0 %v787_v8  ;;  %p861_p0 = scmp.lt.s32.totalorder %s577_s4, %s859_s11  ;;  %p862_p1 = scmp.lt.s32.totalorder %s860_s15, %s854_s9 }
  0x35   : > { %356 = vmatprep.subr.bf16.mxu0 %v788_v10  ;;  %p857_p13 = pneg %p856_p11 }
  0x36   : > { %p863_p2 = por %p862_p1, %p861_p0 }
  0x38   : > { %357 = vmatpush1.bf16.msra.mxu0 %v790_v12  ;;  %p864_p3 = pnand %p863_p2, %p857_p13 }
  0x39   : > { %358 = vmatprep.subr.bf16.mxu0 %v791_v13 }
  0x3c   : > { %359 = vmatpush1.bf16.msra.mxu0 %v793_v14 }
  0x3d   : > { %360 = vmatprep.subr.bf16.mxu0 %v794_v15 }
  0x40   : > { %361 = vmatpush1.bf16.msra.mxu0 %v796_v16 }
  0x41   : > { %362 = vmatprep.subr.bf16.mxu0 %v797_v17 }
  0x44   : > { %363 = vmatpush1.bf16.msra.mxu0 %v799_v18 }
  0x47   : > { %381 = vmatmul.mubr.bf16.vlgmr.msra.gmra.mxu0 %v251_v19 }
  0xa9   : > { %v441_v52 = vpop.permute.xlu0 %440 }
  0xaa   : > { %vm442_vm4 = vcmp.eq.s32.totalorder %v441_v52, 1 }
 0x107   : > { %v1050_v21 = vpop.f32.mrf.mxu0 }
 0x108   : > { %v414_v22 = vsub.f32 0.0, %v1050_v21  ;;  %v410_v36 = vmax.f32 %v1050_v21, 0.0  ;;  %vm409_vm8 = vcmp.ge.f32.partialorder %v1050_v21, 0.0 }
 0x109   : > { %v384_v23 = vpop.f32.mrf.mxu0 }
 0x10a   : > { %v418_v24 = vand.u32 2147483647, %v414_v22  ;;  %v392_v25 = vand.u32 2147483647, %v384_v23  ;;  %v411_v39 = vadd.f32 0.5, %v410_v36  ;;  %v389_v51 = vmax.f32 %v384_v23, 0.0 }
 0x10b   : > { %v386_v26 = vpop.f32.mrf.mxu0  ;;  %v415_v55 = vmax.f32 %v414_v22, 0.0  ;;  %vm390_vm3 = vcmp.ne.f32.partialorder %v384_v23, %v384_v23  ;;  %vm416_vm6 = vcmp.ne.f32.partialorder %v414_v22, %v414_v22 }
 0x10c   : > { %v419_v27 = vsub.f32 0.0, %v418_v24  ;;  %v393_v28 = vsub.f32 0.0, %v392_v25 }
 0x10d   : > { %v387_v29 = vpop.f32.mrf.mxu0 }
 0x10e   : > { %v420_v30 = vmul.f32 1.442695, %v419_v27  ;;  %v394_v31 = vmul.f32 1.442695, %v393_v28 }
 0x110   : > { %800 = vpow2.f32 %v420_v30 }
 0x111   : > { %802 = vpow2.f32 %v394_v31 }
 0x11d   : > { %v801_v32 = vpop.eup %800 }
 0x11e   : > { %v803_v33 = vpop.eup %802  ;;  %v422_v34 = vadd.f32 1.0, %v801_v32  ;;  %v425_v38 = vmul.f32 -0.5, %v801_v32  ;;  %v428_v43 = vand.u32 2147483647, %v801_v32 }
 0x11f   : > { %v396_v35 = vadd.f32 1.0, %v803_v33  ;;  %v399_v37 = vmul.f32 -0.5, %v803_v33  ;;  %v402_v42 = vand.u32 2147483647, %v803_v33 }
 0x120   : > { %804 = vlog2.f32 %v422_v34  ;;  %v426_v41 = vadd.f32 1.0, %v425_v38  ;;  %vm429_vm2 = vcmp.lt.f32.partialorder %v428_v43, 0.0004427343 }
 0x121   : > { %806 = vlog2.f32 %v396_v35  ;;  %v400_v40 = vadd.f32 1.0, %v399_v37  ;;  %vm403_vm1 = vcmp.lt.f32.partialorder %v402_v42, 0.0004427343 }
 0x122   : > { %808 = vlog2.f32 %v411_v39  ;;  %v427_v50 = vmul.f32 %v801_v32, %v426_v41 }
 0x123   : > { %v401_v49 = vmul.f32 %v803_v33, %v400_v40 }
 0x12d   : > { %v805_v44 = vpop.eup %804 }
 0x12e   : > { %v807_v45 = vpop.eup %806  ;;  %v424_v46 = vmul.f32 0.6931472, %v805_v44 }
 0x12f   : > { %v398_v48 = vmul.f32 0.6931472, %v807_v45  ;;  %v809_v0 = vpop.eup %808 }
 0x130   : > { %v430_v54 = vsel %vm429_vm2, %v427_v50, %v424_v46  ;;  %v413_v4 = vmul.f32 0.6931472, %v809_v0 }
 0x131   : > { %v404_v53 = vsel %vm403_vm1, %v401_v49, %v398_v48  ;;  %v431_v59 = vadd.f32 %v430_v54, %v415_v55 }
 0x132   : > { %v405_v56 = vadd.f32 %v404_v53, %v389_v51 }
 0x133   : > { %v432_v62 = vsel %vm416_vm6, %v414_v22, %v431_v59 }
 0x134   : > { %v406_v58 = vsel %vm390_vm3, %v384_v23, %v405_v56  ;;  %v433_v2 = vsub.f32 0.0, %v432_v62 }
 0x135   : > { %v407_v60 = vsub.f32 0.0, %v406_v58 }
 0x136   : > { %v434_v7 = vsel %vm409_vm8, %v413_v4, %v433_v2 }
 0x137   : > { %v443_v61 = vsel %vm442_vm4, -100.0, %v407_v60  ;;  %v408_v6 = vadd.f32 %v407_v60, %v384_v23 }
 0x138   : > { %v447_v63 = vrot.slane %v443_v61, 7 }
 0x139   : > { %v435_v10 = vadd.f32 %v434_v7, %v408_v6 }
 0x13a   : > { %v451_v1 = vsel %vm448_vm5, 0.0, %v447_v63 }
 0x13b   : > { %v452_v3 = vadd.f32 %v451_v1, %v443_v61  ;;  %v444_v14 = vsel %vm442_vm4, -100.0, %v435_v10 }
 0x13d   : > { %v453_v5 = vrot.slane %v452_v3, 6 }
 0x13f   : > { %v457_v8 = vsel %vm454_vm7, 0.0, %v453_v5 }
 0x140   : > { %v458_v9 = vadd.f32 %v457_v8, %v452_v3  ;;  %v700_v8 = vld [vmem:[#allocation2] ss:$0 sm:$0xff] }
 0x142   : > { %v459_v11 = vrot.slane %v458_v9, 4 }
 0x144   : > { %v463_v12 = vsel %vm460_vm9, 0.0, %v459_v11 }
 0x145   : > { %v1067_v13 = vadd.f32 %v463_v12, %v458_v9 }
 0x147   : > { %v465_v15 = vsub.f32 %v444_v14, %v1067_v13 }
 0x149   : > { %v466_v16 = vrot.slane %v465_v15, 7 }
 0x14b   : > { %v467_v17 = vsel %vm448_vm5, -1e+30, %v466_v16 }
 0x14c   : > { %v469_v18 = vsub.f32 %v465_v15, %v467_v17  ;;  %v468_v30 = vmax.f32 %v465_v15, %v467_v17  ;;  %v471_v32 = vadd.f32 %v467_v17, %v465_v15 }
 0x14e   : > { %v472_v19 = vand.u32 2147483647, %v469_v18  ;;  %vm470_vm11 = vcmp.ne.f32.partialorder %v469_v18, %v469_v18 }
 0x150   : > { %v473_v20 = vsub.f32 0.0, %v472_v19 }
 0x152   : > { %v474_v21 = vmul.f32 1.442695, %v473_v20 }
 0x154   : > { %810 = vpow2.f32 %v474_v21 }
 0x161   : > { %v811_v22 = vpop.eup %810 }
 0x162   : > { %v476_v23 = vadd.f32 1.0, %v811_v22  ;;  %v479_v24 = vmul.f32 -0.5, %v811_v22  ;;  %v482_v26 = vand.u32 2147483647, %v811_v22 }
 0x164   : > { %812 = vlog2.f32 %v476_v23  ;;  %v480_v25 = vadd.f32 1.0, %v479_v24  ;;  %vm483_vm10 = vcmp.lt.f32.partialorder %v482_v26, 0.0004427343 }
 0x166   : > { %v481_v29 = vmul.f32 %v811_v22, %v480_v25 }
 0x171   : > { %v813_v27 = vpop.eup %812 }
 0x172   : > { %v478_v28 = vmul.f32 0.6931472, %v813_v27 }
 0x174   : > { %v484_v31 = vsel %vm483_vm10, %v481_v29, %v478_v28 }
 0x175   : > { %v485_v33 = vadd.f32 %v484_v31, %v468_v30 }
 0x177   : > { %v486_v34 = vsel %vm470_vm11, %v471_v32, %v485_v33 }
 0x178   : > { %v487_v35 = vrot.slane %v486_v34, 6 }
 0x17a   : > { %v488_v36 = vsel %vm454_vm7, -1e+30, %v487_v35 }
 0x17b   : > { %v490_v37 = vsub.f32 %v486_v34, %v488_v36  ;;  %v489_v49 = vmax.f32 %v486_v34, %v488_v36  ;;  %v492_v51 = vadd.f32 %v488_v36, %v486_v34 }
 0x17d   : > { %v493_v38 = vand.u32 2147483647, %v490_v37  ;;  %vm491_vm13 = vcmp.ne.f32.partialorder %v490_v37, %v490_v37 }
 0x17f   : > { %v494_v39 = vsub.f32 0.0, %v493_v38 }
 0x181   : > { %v495_v40 = vmul.f32 1.442695, %v494_v39 }
 0x183   : > { %814 = vpow2.f32 %v495_v40 }
 0x190   : > { %v815_v41 = vpop.eup %814 }
 0x191   : > { %v497_v42 = vadd.f32 1.0, %v815_v41  ;;  %v500_v43 = vmul.f32 -0.5, %v815_v41  ;;  %v503_v45 = vand.u32 2147483647, %v815_v41 }
 0x193   : > { %816 = vlog2.f32 %v497_v42  ;;  %v501_v44 = vadd.f32 1.0, %v500_v43  ;;  %vm504_vm12 = vcmp.lt.f32.partialorder %v503_v45, 0.0004427343 }
 0x195   : > { %v502_v48 = vmul.f32 %v815_v41, %v501_v44 }
 0x1a0   : > { %v817_v46 = vpop.eup %816 }
 0x1a1   : > { %v499_v47 = vmul.f32 0.6931472, %v817_v46 }
 0x1a3   : > { %v505_v50 = vsel %vm504_vm12, %v502_v48, %v499_v47 }
 0x1a4   : > { %v506_v52 = vadd.f32 %v505_v50, %v489_v49 }
 0x1a6   : > { %v507_v53 = vsel %vm491_vm13, %v492_v51, %v506_v52 }
 0x1a7   : > { %v508_v54 = vrot.slane %v507_v53, 4 }
 0x1a9   : > { %v509_v55 = vsel %vm460_vm9, -1e+30, %v508_v54 }
 0x1aa   : > { %v511_v56 = vsub.f32 %v507_v53, %v509_v55  ;;  %v510_v5 = vmax.f32 %v507_v53, %v509_v55  ;;  %v513_v7 = vadd.f32 %v509_v55, %v507_v53 }
 0x1ac   : > { %v514_v58 = vand.u32 2147483647, %v511_v56  ;;  %vm512_vm15 = vcmp.ne.f32.partialorder %v511_v56, %v511_v56 }
 0x1ae   : > { %v515_v59 = vsub.f32 0.0, %v514_v58 }
 0x1b0   : > { %v516_v60 = vmul.f32 1.442695, %v515_v59 }
 0x1b2   : > { %818 = vpow2.f32 %v516_v60 }
 0x1bf   : > { %v819_v61 = vpop.eup %818 }
 0x1c0   : > { %v518_v62 = vadd.f32 1.0, %v819_v61  ;;  %v521_v63 = vmul.f32 -0.5, %v819_v61  ;;  %v524_v1 = vand.u32 2147483647, %v819_v61 }
 0x1c2   : > { %820 = vlog2.f32 %v518_v62  ;;  %v522_v0 = vadd.f32 1.0, %v521_v63  ;;  %vm525_vm14 = vcmp.lt.f32.partialorder %v524_v1, 0.0004427343 }
 0x1c4   : > { %v523_v4 = vmul.f32 %v819_v61, %v522_v0 }
 0x1cf   : > { %v821_v2 = vpop.eup %820 }
 0x1d0   : > { %v520_v3 = vmul.f32 0.6931472, %v821_v2 }
 0x1d2   : > { %v526_v6 = vsel %vm525_vm14, %v523_v4, %v520_v3 }
 0x1d3   : > { %v527_v57 = vadd.f32 %v526_v6, %v510_v5 }
 0x1d5   : > { %v528_v9 = vsel %vm512_vm15, %v513_v7, %v527_v57 }
 0x1d6   : > { %v537_v10 = vsub.f32 %v700_v8, %v528_v9  ;;  %v536_v23 = vmax.f32 %v700_v8, %v528_v9  ;;  %v539_v25 = vadd.f32 %v700_v8, %v528_v9 }
 0x1d8   : > { %v540_v11 = vand.u32 2147483647, %v537_v10  ;;  %vm538_vm1 = vcmp.ne.f32.partialorder %v537_v10, %v537_v10 }
 0x1da   : > { %v541_v12 = vsub.f32 0.0, %v540_v11 }
 0x1dc   : > { %v542_v14 = vmul.f32 1.442695, %v541_v12 }
 0x1de   : > { %822 = vpow2.f32 %v542_v14 }
 0x1eb   : > { %v823_v15 = vpop.eup %822 }
 0x1ec   : > { %v544_v16 = vadd.f32 1.0, %v823_v15  ;;  %v547_v17 = vmul.f32 -0.5, %v823_v15  ;;  %v550_v19 = vand.u32 2147483647, %v823_v15 }
 0x1ee   : > { %824 = vlog2.f32 %v544_v16  ;;  %v548_v18 = vadd.f32 1.0, %v547_v17  ;;  %vm551_vm0 = vcmp.lt.f32.partialorder %v550_v19, 0.0004427343 }
 0x1f0   : > { %v549_v22 = vmul.f32 %v823_v15, %v548_v18 }
 0x1fb   : > { %v825_v20 = vpop.eup %824 }
 0x1fc   : > { %v546_v21 = vmul.f32 0.6931472, %v825_v20 }
 0x1fe   : > { %v552_v24 = vsel %vm551_vm0, %v549_v22, %v546_v21 }
 0x1ff   : > { %v553_v26 = vadd.f32 %v552_v24, %v536_v23 }
 0x201   : > { %v554_v27 = vsel %vm538_vm1, %v539_v25, %v553_v26 }
 0x202   : > { %v555_v28 = vadd.f32 %v554_v27, %v1067_v13 }
 0x204   : > { %v556_v29 = vmul.f32 1.442695, %v555_v28  ;;  %559 = vst [vmem:[#allocation2 - $0x7] sm:$0x80] %v555_v28 }
 0x206   : > { %826 = vpow2.f32 %v556_v29 }
 0x213   : > { %v827_v30 = vpop.eup %826 }
 0x214   : > { %558 = vst [vmem:[%s230_s30] sm:$0xff] %v827_v30 }
 0x215   : > { %867 = shalt.err (!%p864_p3)
}
 0x216   : > { %s868_s18 = scalar_lea.hbm %s1083_s7, 128  ;;  %s872_s23 = scalar_lea.hbm %s1126_s3, 256 }
 0x217   : > { %p869_p5 = scmp.ne.s32.totalorder %s1083_s7, %s868_s18  ;;  %p873_p9 = scmp.lt.s32.totalorder %s1083_s7, %s1126_s3 }
 0x218   : > { %p874_p12 = scmp.lt.s32.totalorder %s872_s23, %s868_s18 }
 0x219   : > { %p870_p6 = pnand %p869_p5, %p1002_p4 }
 0x21a   : > { %p875_p10 = por %p874_p12, %p873_p9 }
 0x21b   : > { %p871_p7 = pneg %p870_p6 }
 0x21d   : > { %p876_p11 = pnand %p875_p10, %p871_p7 }
 0x21f   : > { %879 = shalt.err (!%p876_p11)
}
 0x220   : > { %709 = dma.vmem_to_hbm [thread:$0]  (%p1002_p4), %s577_s4, 128, %s1083_s7, %s561_s8  }
 0x221 PF: > { %p721_p13 = scmp.ge.s32.totalorder %s934_s17, 2  ;;  %s588_s28 = sand.u32 1, %s914_s12  }
 0x222   : > { %s589_s29 = scalar_lea.sflag [#allocation5], %s588_s28 }
 0x223   : > { %p716_p0 = pnand %p721_p13, %p1009_p8 }
 0x225   : > { %p717_p1 = pneg %p716_p0 }
 0x227   : > { %909 = dma.done.wait (%p717_p1), %s589_s29, 128  }
 0x228   : > { %911 = vsyncadd (%p717_p1), %s589_s29, 4294967168  ;;  %s17_s17 = sadd.s32 1, %s934_s17   ;;  %s1131_s12 = smov %s918_s13 }
 0x229   : > { %p14_p2 = scmp.ge.s32.totalorder %s17_s17, 4   ;;  %s1132_s13 = smov %s922_s14 }
 0x22a   : > { %s1133_s14 = smov %s1015_s25  ;;  %s1134_s15 = smov %s930_s16 }
 0x22b   : > { %s1135_s16 = smov %s1137_s20  ;;  %16 = sbr.rel (!%p14_p2) target bundleno = 5 (0x5), region = 80 }
 0x230   :  { %594 = vsyncpa [#allocation4], 1 }
 0x231   :  { %596 = vsyncpa [#allocation4 + $0x1], 1 }
 0x232   :  { %597 = vsyncpa [#allocation5], 1 }
 0x233   :  { %599 = vsyncpa [#allocation5 + $0x1], 1 }

// kernel: tpu_custom_call.1
= control target key start
LH: loop header
LB: loop body
LE: loop exit
PB: predicated region body
PF: predicated region fallthrough
CT: control target
= control target key end

     0   :  { %8 = vsyncpa [#allocation4], 0  ;;  %s1123_s0 = inlined_call_operand.vmem [shape: bf16[16,128], index: 0, kind: input, shape index: {}]   ;;  %s1124_s1 = inlined_call_operand.hbm [shape: bf16[128,256], index: 1, kind: input, shape index: {}]   ;;  %s1125_s2 = inlined_call_operand.vmem [shape: f32[16,1], index: 2, kind: input, shape index: {}]   ;;  %s1126_s3 = inlined_call_operand.hbm [shape: f32[16,128], index: 3, kind: output, shape index: {}]  }
   0x1   :  { %9 = vsyncpa [#allocation5], 0 }
   0x2   :  { %11 = vsyncpa [#allocation5 + $0x1], 0  ;;  %s962_s12 = smov 0   ;;  %s964_s13 = smov 0  }
   0x3   :  { %s966_s14 = smov 0   ;;  %s968_s15 = smov 0  }
   0x4   :  { %s970_s16 = smov 0   ;;  %s972_s17 = smov 0  }
   0x5 LB: > { %s674_s18 = sadd.s32 4294967295, %s934_s17   ;;  %s675_s19 = sadd.s32 4294967294, %s934_s17   ;;  %s934_s17 = sphi %s972_s17, %s17_s17   ;;  %s930_s16 = sphi %s970_s16, %s1135_s16   ;;  %s926_s15 = sphi %s968_s15, %s1134_s15   ;;  %s922_s14 = sphi %s966_s14, %s1133_s14   ;;  %s918_s13 = sphi %s964_s13, %s1132_s13   ;;  %s914_s12 = sphi %s962_s12, %s1131_s12  }
   0x6   : > { %s32_s20 = sadd.s32 1, %s930_s16  ;;  %s129_s21 = sadd.s32 1, %s922_s14 }
   0x7   : > { %p34_p0 = scmp.ge.s32.totalorder %s32_s20, 2  ;;  %p139_p1 = scmp.ne.s32.totalorder %s922_s14, %s918_s13 }
   0x8   : > { %p140_p2 = scmp.eq.s32.totalorder %s674_s18, 1  ;;  %p145_p3 = scmp.ne.s32.totalorder %s918_s13, %s914_s12 }
   0x9   : > { %s1137_s20 = smov (%p34_p0, %s32_s20), 0  ;;  %p146_p5 = scmp.eq.s32.totalorder %s675_s19, 1 }
   0xa   : > { %p1002_p4 = por %p140_p2, %p139_p1  ;;  %s124_s23 = ssub.s32 %s930_s16, %s1137_s20 }
   0xb   : > { %p676_p6 = scmp.ge.s32.totalorder %s934_s17, 1  ;;  %p127_p7 = scmp.eq.s32.totalorder %s124_s23, 0 }
   0xc   : > { %p1009_p8 = por %p146_p5, %p145_p3  ;;  %p153_p9 = scmp.lt.s32.totalorder %s934_s17, 3 }
   0xd   : > { %s1015_s25 = scalar_select %p127_p7, %s922_s14, %s129_s21  }
   0xe   : > { %p1017_p10 = pnand %p676_p6, %p153_p9  ;;  %p1021_p11 = scmp.eq.s32.totalorder %s674_s18, 0 }
   0xf   : > { %s936_s28 = smov [#allocation3]  }
  0x10   : > { %p711_p12 = pneg %p1017_p10  ;;  %s168_s29 = sshll.u32 %s936_s28, 4  ;;  %s169_s29 = int_to_ptr.vmem [resolvable:$true] %s168_s29 }
  0x11   : > { %s839_s30 = scalar_lea.vmem %s169_s29, 2048  ;;  %p847_p5 = scmp.lt.s32.totalorder %s169_s29, %s169_s29 }
  0x12   : > { %p712_p13 = pnand %p1021_p11, %p711_p12  ;;  %p840_p1 = scmp.ne.s32.totalorder %s169_s29, %s839_s30 }
  0x13   : > { %p848_p6 = scmp.lt.s32.totalorder %s839_s30, %s839_s30 }
  0x14   : > { %p830_p0 = pneg %p712_p13 }
  0x15   : > { %p849_p7 = por %p848_p6, %p847_p5 }
  0x16   : > { %p842_p2 = pnand %p840_p1, %p830_p0 }
  0x18   : > { %p843_p3 = pneg %p842_p2 }
  0x1a   : > { %p850_p9 = pnand %p849_p7, %p843_p3 }
  0x1c   : > { %853 = shalt.err (!%p850_p9)
}
  0x1d   : > { %s937_s4 = smov 128   ;;  %s938_s5 = smov 8  }
  0x1e   : > { %714 = dma.hbm_to_vmem [thread:$0]  (!%p712_p13), %s1124_s1, 2048, %s169_s29, [#allocation4], %s937_s4, %s937_s4, %s938_s5  }
  0x1f   : > { %202 = sbr.rel (%p1017_p10) target bundleno = 545 (0x221), region = 32 }
  0x24   : > { %905 = dma.done.wait (%p1021_p11), [#allocation4], 2048  }
  0x25   : > { %907 = vsyncadd (%p1021_p11), [#allocation4], 4294965248  ;;  %v939_v0 = vmov 0   ;;  %p232_p12 = scmp.lt.s32.totalorder %s926_s15, 1  ;;  %v776_v1 = vld [vmem:[#allocation3 + $0x74] ss:$8 sps:$4 sm:$0xff]   ;;  %v445_v47 = vlaneseq }
  0x26   : > { %380 = vmatprep.mubr.bf16.mxu0 %v939_v0  ;;  %775 = vset.pattern.permute.xlu0 %v939_v0  ;;  %v778_v2 = vld [vmem:[#allocation3 + $0x70] ss:$8 sps:$4 sm:$0xff]   ;;  %v779_v3 = vld [vmem:[#allocation3 + $0x64] ss:$8 sps:$4 sm:$0xff]   ;;  %v781_v4 = vld [vmem:[#allocation3 + $0x60] ss:$8 sps:$4 sm:$0xff]  }
  0x27   : > { %348 = vmatprep.subr.bf16.mxu0 %v776_v1  ;;  %s1040_s8 = scalar_select %p232_p12, %s926_s15, 1  ;;  %v782_v5 = vld [vmem:[#allocation3 + $0x54] ss:$8 sps:$4 sm:$0xff]   ;;  %v784_v6 = vld [vmem:[#allocation3 + $0x50] ss:$8 sps:$4 sm:$0xff]   ;;  %v1054_v57 = vshrl.u32 %v445_v47, 7 }
  0x28   : > { %349 = vmatpush1.bf16.msra.mxu0 %v778_v2  ;;  %v785_v7 = vld [vmem:[#allocation3 + $0x44] ss:$8 sps:$4 sm:$0xff]   ;;  %v787_v8 = vld [vmem:[#allocation3 + $0x40] ss:$8 sps:$4 sm:$0xff]   ;;  %v788_v10 = vld [vmem:[#allocation3 + $0x34] ss:$8 sps:$4 sm:$0xff]  }
  0x29   : > { %350 = vmatprep.subr.bf16.mxu0 %v779_v3  ;;  %s683_s9 = sshll.u32 %s1040_s8, 3  ;;  %v790_v12 = vld [vmem:[#allocation3 + $0x30] ss:$8 sps:$4 sm:$0xff]   ;;  %v791_v13 = vld [vmem:[#allocation3 + $0x24] ss:$8 sps:$4 sm:$0xff]   ;;  %s682_s19 = sshll.u32 %s1040_s8, 2 }
  0x2a   : > { %s242_s18 = scalar_lea.vmem %s1125_s2, %s683_s9  ;;  %v793_v14 = vld [vmem:[#allocation3 + $0x20] ss:$8 sps:$4 sm:$0xff]   ;;  %v794_v15 = vld [vmem:[#allocation3 + $0x14] ss:$8 sps:$4 sm:$0xff]   ;;  %v796_v16 = vld [vmem:[#allocation3 + $0x10] ss:$8 sps:$4 sm:$0xff]   ;;  %s235_s26 = scalar_lea.vmem %s1123_s0, %s682_s19 }
  0x2b   : > { %v436_v9 = vld [vmem:[%s242_s18] sm:$0xff]  ;;  %v940_v20 = vmov -1e+30   ;;  %vm448_vm5 = vcmp.lt.s32.totalorder %v1054_v57, 1  ;;  %vm454_vm7 = vcmp.lt.s32.totalorder %v1054_v57, 2  ;;  %vm460_vm9 = vcmp.lt.s32.totalorder %v1054_v57, 4 }
  0x2c   : > { %351 = vmatpush1.bf16.msra.mxu0 %v781_v4  ;;  %vm437_vm0 = vcmp.gt.f32.partialorder %v436_v9, 0.5  ;;  %v797_v17 = vld [vmem:[#allocation3 + $0x4] ss:$8 sps:$4 sm:$0xff]   ;;  %v799_v18 = vld [vmem:[#allocation3] ss:$8 sps:$4 sm:$0xff]   ;;  %s228_s27 = sand.u32 1, %s918_s13  }
  0x2d   : > { %352 = vmatprep.subr.bf16.mxu0 %v782_v5  ;;  %v438_v11 = vsel %vm437_vm0, 1, %v939_v0  ;;  %v251_v19 = vld [vmem:[%s235_s26] sm:$0xf]  ;;  %250 = vst [vmem:[#allocation2] sm:$0x1] %v940_v20  ;;  %s681_s28 = sshll.u32 %s228_s27, 3 }
  0x2e   : > { %440 = vperm.xlu0 %775, %v438_v11   ;;  %s702_s29 = sshll.u32 %s926_s15, 7  ;;  %s230_s30 = scalar_lea.vmem [#allocation6], %s681_s28 }
  0x2f   : > { %s576_s4 = sshll.u32 %s230_s30, 4  ;;  %s1083_s7 = scalar_lea.hbm %s1126_s3, %s702_s29  ;;  %s577_s4 = int_to_ptr.vmem [resolvable:$true] %s576_s4 }
  0x30   : > { %353 = vmatpush1.bf16.msra.mxu0 %v784_v6  ;;  %s561_s8 = scalar_lea.sflag [#allocation5], %s228_s27  ;;  %s854_s9 = scalar_lea.vmem %s577_s4, 128 }
  0x31   : > { %354 = vmatprep.subr.bf16.mxu0 %v785_v7  ;;  %p855_p10 = scmp.ne.s32.totalorder %s577_s4, %s854_s9  ;;  %s941_s10 = smov [#allocation6]  }
  0x32   : > { %s858_s11 = sshll.u32 %s941_s10, 4  ;;  %s859_s11 = int_to_ptr.vmem [resolvable:$false] %s858_s11 }
  0x33   : > { %p856_p11 = pnand %p855_p10, %p1002_p4  ;;  %s860_s15 = scalar_lea.vmem %s859_s11, 256 }
  0x34   : > { %355 = vmatpush1.bf16.msra.mxu0 %v787_v8  ;;  %p861_p0 = scmp.lt.s32.totalorder %s577_s4, %s859_s11  ;;  %p862_p1 = scmp.lt.s32.totalorder %s860_s15, %s854_s9 }
  0x35   : > { %356 = vmatprep.subr.bf16.mxu0 %v788_v10  ;;  %p857_p13 = pneg %p856_p11 }
  0x36   : > { %p863_p2 = por %p862_p1, %p861_p0 }
  0x38   : > { %357 = vmatpush1.bf16.msra.mxu0 %v790_v12  ;;  %p864_p3 = pnand %p863_p2, %p857_p13 }
  0x39   : > { %358 = vmatprep.subr.bf16.mxu0 %v791_v13 }
  0x3c   : > { %359 = vmatpush1.bf16.msra.mxu0 %v793_v14 }
  0x3d   : > { %360 = vmatprep.subr.bf16.mxu0 %v794_v15 }
  0x40   : > { %361 = vmatpush1.bf16.msra.mxu0 %v796_v16 }
  0x41   : > { %362 = vmatprep.subr.bf16.mxu0 %v797_v17 }
  0x44   : > { %363 = vmatpush1.bf16.msra.mxu0 %v799_v18 }
  0x47   : > { %381 = vmatmul.mubr.bf16.vlgmr.msra.gmra.mxu0 %v251_v19 }
  0xa9   : > { %v441_v52 = vpop.permute.xlu0 %440 }
  0xaa   : > { %vm442_vm4 = vcmp.eq.s32.totalorder %v441_v52, 1 }
 0x107   : > { %v1050_v21 = vpop.f32.mrf.mxu0 }
 0x108   : > { %v414_v22 = vsub.f32 0.0, %v1050_v21  ;;  %v410_v36 = vmax.f32 %v1050_v21, 0.0  ;;  %vm409_vm8 = vcmp.ge.f32.partialorder %v1050_v21, 0.0 }
 0x109   : > { %v384_v23 = vpop.f32.mrf.mxu0 }
 0x10a   : > { %v418_v24 = vand.u32 2147483647, %v414_v22  ;;  %v392_v25 = vand.u32 2147483647, %v384_v23  ;;  %v411_v39 = vadd.f32 0.5, %v410_v36  ;;  %v389_v51 = vmax.f32 %v384_v23, 0.0 }
 0x10b   : > { %v386_v26 = vpop.f32.mrf.mxu0  ;;  %v415_v55 = vmax.f32 %v414_v22, 0.0  ;;  %vm390_vm3 = vcmp.ne.f32.partialorder %v384_v23, %v384_v23  ;;  %vm416_vm6 = vcmp.ne.f32.partialorder %v414_v22, %v414_v22 }
 0x10c   : > { %v419_v27 = vsub.f32 0.0, %v418_v24  ;;  %v393_v28 = vsub.f32 0.0, %v392_v25 }
 0x10d   : > { %v387_v29 = vpop.f32.mrf.mxu0 }
 0x10e   : > { %v420_v30 = vmul.f32 1.442695, %v419_v27  ;;  %v394_v31 = vmul.f32 1.442695, %v393_v28 }
 0x110   : > { %800 = vpow2.f32 %v420_v30 }
 0x111   : > { %802 = vpow2.f32 %v394_v31 }
 0x11d   : > { %v801_v32 = vpop.eup %800 }
 0x11e   : > { %v803_v33 = vpop.eup %802  ;;  %v422_v34 = vadd.f32 1.0, %v801_v32  ;;  %v425_v38 = vmul.f32 -0.5, %v801_v32  ;;  %v428_v43 = vand.u32 2147483647, %v801_v32 }
 0x11f   : > { %v396_v35 = vadd.f32 1.0, %v803_v33  ;;  %v399_v37 = vmul.f32 -0.5, %v803_v33  ;;  %v402_v42 = vand.u32 2147483647, %v803_v33 }
 0x120   : > { %804 = vlog2.f32 %v422_v34  ;;  %v426_v41 = vadd.f32 1.0, %v425_v38  ;;  %vm429_vm2 = vcmp.lt.f32.partialorder %v428_v43, 0.0004427343 }
 0x121   : > { %806 = vlog2.f32 %v396_v35  ;;  %v400_v40 = vadd.f32 1.0, %v399_v37  ;;  %vm403_vm1 = vcmp.lt.f32.partialorder %v402_v42, 0.0004427343 }
 0x122   : > { %808 = vlog2.f32 %v411_v39  ;;  %v427_v50 = vmul.f32 %v801_v32, %v426_v41 }
 0x123   : > { %v401_v49 = vmul.f32 %v803_v33, %v400_v40 }
 0x12d   : > { %v805_v44 = vpop.eup %804 }
 0x12e   : > { %v807_v45 = vpop.eup %806  ;;  %v424_v46 = vmul.f32 0.6931472, %v805_v44 }
 0x12f   : > { %v398_v48 = vmul.f32 0.6931472, %v807_v45  ;;  %v809_v0 = vpop.eup %808 }
 0x130   : > { %v430_v54 = vsel %vm429_vm2, %v427_v50, %v424_v46  ;;  %v413_v4 = vmul.f32 0.6931472, %v809_v0 }
 0x131   : > { %v404_v53 = vsel %vm403_vm1, %v401_v49, %v398_v48  ;;  %v431_v59 = vadd.f32 %v430_v54, %v415_v55 }
 0x132   : > { %v405_v56 = vadd.f32 %v404_v53, %v389_v51 }
 0x133   : > { %v432_v62 = vsel %vm416_vm6, %v414_v22, %v431_v59 }
 0x134   : > { %v406_v58 = vsel %vm390_vm3, %v384_v23, %v405_v56  ;;  %v433_v2 = vsub.f32 0.0, %v432_v62 }
 0x135   : > { %v407_v60 = vsub.f32 0.0, %v406_v58 }
 0x136   : > { %v434_v7 = vsel %vm409_vm8, %v413_v4, %v433_v2 }
 0x137   : > { %v443_v61 = vsel %vm442_vm4, -100.0, %v407_v60  ;;  %v408_v6 = vadd.f32 %v407_v60, %v384_v23 }
 0x138   : > { %v447_v63 = vrot.slane %v443_v61, 7 }
 0x139   : > { %v435_v10 = vadd.f32 %v434_v7, %v408_v6 }
 0x13a   : > { %v451_v1 = vsel %vm448_vm5, 0.0, %v447_v63 }
 0x13b   : > { %v452_v3 = vadd.f32 %v451_v1, %v443_v61  ;;  %v444_v14 = vsel %vm442_vm4, -100.0, %v435_v10 }
 0x13d   : > { %v453_v5 = vrot.slane %v452_v3, 6 }
 0x13f   : > { %v457_v8 = vsel %vm454_vm7, 0.0, %v453_v5 }
 0x140   : > { %v458_v9 = vadd.f32 %v457_v8, %v452_v3  ;;  %v700_v8 = vld [vmem:[#allocation2] ss:$0 sm:$0xff] }
 0x142   : > { %v459_v11 = vrot.slane %v458_v9, 4 }
 0x144   : > { %v463_v12 = vsel %vm460_vm9, 0.0, %v459_v11 }
 0x145   : > { %v1067_v13 = vadd.f32 %v463_v12, %v458_v9 }
 0x147   : > { %v465_v15 = vsub.f32 %v444_v14, %v1067_v13 }
 0x149   : > { %v466_v16 = vrot.slane %v465_v15, 7 }
 0x14b   : > { %v467_v17 = vsel %vm448_vm5, -1e+30, %v466_v16 }
 0x14c   : > { %v469_v18 = vsub.f32 %v465_v15, %v467_v17  ;;  %v468_v30 = vmax.f32 %v465_v15, %v467_v17  ;;  %v471_v32 = vadd.f32 %v467_v17, %v465_v15 }
 0x14e   : > { %v472_v19 = vand.u32 2147483647, %v469_v18  ;;  %vm470_vm11 = vcmp.ne.f32.partialorder %v469_v18, %v469_v18 }
 0x150   : > { %v473_v20 = vsub.f32 0.0, %v472_v19 }
 0x152   : > { %v474_v21 = vmul.f32 1.442695, %v473_v20 }
 0x154   : > { %810 = vpow2.f32 %v474_v21 }
 0x161   : > { %v811_v22 = vpop.eup %810 }
 0x162   : > { %v476_v23 = vadd.f32 1.0, %v811_v22  ;;  %v479_v24 = vmul.f32 -0.5, %v811_v22  ;;  %v482_v26 = vand.u32 2147483647, %v811_v22 }
 0x164   : > { %812 = vlog2.f32 %v476_v23  ;;  %v480_v25 = vadd.f32 1.0, %v479_v24  ;;  %vm483_vm10 = vcmp.lt.f32.partialorder %v482_v26, 0.0004427343 }
 0x166   : > { %v481_v29 = vmul.f32 %v811_v22, %v480_v25 }
 0x171   : > { %v813_v27 = vpop.eup %812 }
 0x172   : > { %v478_v28 = vmul.f32 0.6931472, %v813_v27 }
 0x174   : > { %v484_v31 = vsel %vm483_vm10, %v481_v29, %v478_v28 }
 0x175   : > { %v485_v33 = vadd.f32 %v484_v31, %v468_v30 }
 0x177   : > { %v486_v34 = vsel %vm470_vm11, %v471_v32, %v485_v33 }
 0x178   : > { %v487_v35 = vrot.slane %v486_v34, 6 }
 0x17a   : > { %v488_v36 = vsel %vm454_vm7, -1e+30, %v487_v35 }
 0x17b   : > { %v490_v37 = vsub.f32 %v486_v34, %v488_v36  ;;  %v489_v49 = vmax.f32 %v486_v34, %v488_v36  ;;  %v492_v51 = vadd.f32 %v488_v36, %v486_v34 }
 0x17d   : > { %v493_v38 = vand.u32 2147483647, %v490_v37  ;;  %vm491_vm13 = vcmp.ne.f32.partialorder %v490_v37, %v490_v37 }
 0x17f   : > { %v494_v39 = vsub.f32 0.0, %v493_v38 }
 0x181   : > { %v495_v40 = vmul.f32 1.442695, %v494_v39 }
 0x183   : > { %814 = vpow2.f32 %v495_v40 }
 0x190   : > { %v815_v41 = vpop.eup %814 }
 0x191   : > { %v497_v42 = vadd.f32 1.0, %v815_v41  ;;  %v500_v43 = vmul.f32 -0.5, %v815_v41  ;;  %v503_v45 = vand.u32 2147483647, %v815_v41 }
 0x193   : > { %816 = vlog2.f32 %v497_v42  ;;  %v501_v44 = vadd.f32 1.0, %v500_v43  ;;  %vm504_vm12 = vcmp.lt.f32.partialorder %v503_v45, 0.0004427343 }
 0x195   : > { %v502_v48 = vmul.f32 %v815_v41, %v501_v44 }
 0x1a0   : > { %v817_v46 = vpop.eup %816 }
 0x1a1   : > { %v499_v47 = vmul.f32 0.6931472, %v817_v46 }
 0x1a3   : > { %v505_v50 = vsel %vm504_vm12, %v502_v48, %v499_v47 }
 0x1a4   : > { %v506_v52 = vadd.f32 %v505_v50, %v489_v49 }
 0x1a6   : > { %v507_v53 = vsel %vm491_vm13, %v492_v51, %v506_v52 }
 0x1a7   : > { %v508_v54 = vrot.slane %v507_v53, 4 }
 0x1a9   : > { %v509_v55 = vsel %vm460_vm9, -1e+30, %v508_v54 }
 0x1aa   : > { %v511_v56 = vsub.f32 %v507_v53, %v509_v55  ;;  %v510_v5 = vmax.f32 %v507_v53, %v509_v55  ;;  %v513_v7 = vadd.f32 %v509_v55, %v507_v53 }
 0x1ac   : > { %v514_v58 = vand.u32 2147483647, %v511_v56  ;;  %vm512_vm15 = vcmp.ne.f32.partialorder %v511_v56, %v511_v56 }
 0x1ae   : > { %v515_v59 = vsub.f32 0.0, %v514_v58 }
 0x1b0   : > { %v516_v60 = vmul.f32 1.442695, %v515_v59 }
 0x1b2   : > { %818 = vpow2.f32 %v516_v60 }
 0x1bf   : > { %v819_v61 = vpop.eup %818 }
 0x1c0   : > { %v518_v62 = vadd.f32 1.0, %v819_v61  ;;  %v521_v63 = vmul.f32 -0.5, %v819_v61  ;;  %v524_v1 = vand.u32 2147483647, %v819_v61 }
 0x1c2   : > { %820 = vlog2.f32 %v518_v62  ;;  %v522_v0 = vadd.f32 1.0, %v521_v63  ;;  %vm525_vm14 = vcmp.lt.f32.partialorder %v524_v1, 0.0004427343 }
 0x1c4   : > { %v523_v4 = vmul.f32 %v819_v61, %v522_v0 }
 0x1cf   : > { %v821_v2 = vpop.eup %820 }
 0x1d0   : > { %v520_v3 = vmul.f32 0.6931472, %v821_v2 }
 0x1d2   : > { %v526_v6 = vsel %vm525_vm14, %v523_v4, %v520_v3 }
 0x1d3   : > { %v527_v57 = vadd.f32 %v526_v6, %v510_v5 }
 0x1d5   : > { %v528_v9 = vsel %vm512_vm15, %v513_v7, %v527_v57 }
 0x1d6   : > { %v537_v10 = vsub.f32 %v700_v8, %v528_v9  ;;  %v536_v23 = vmax.f32 %v700_v8, %v528_v9  ;;  %v539_v25 = vadd.f32 %v700_v8, %v528_v9 }
 0x1d8   : > { %v540_v11 = vand.u32 2147483647, %v537_v10  ;;  %vm538_vm1 = vcmp.ne.f32.partialorder %v537_v10, %v537_v10 }
 0x1da   : > { %v541_v12 = vsub.f32 0.0, %v540_v11 }
 0x1dc   : > { %v542_v14 = vmul.f32 1.442695, %v541_v12 }
 0x1de   : > { %822 = vpow2.f32 %v542_v14 }
 0x1eb   : > { %v823_v15 = vpop.eup %822 }
 0x1ec   : > { %v544_v16 = vadd.f32 1.0, %v823_v15  ;;  %v547_v17 = vmul.f32 -0.5, %v823_v15  ;;  %v550_v19 = vand.u32 2147483647, %v823_v15 }
 0x1ee   : > { %824 = vlog2.f32 %v544_v16  ;;  %v548_v18 = vadd.f32 1.0, %v547_v17  ;;  %vm551_vm0 = vcmp.lt.f32.partialorder %v550_v19, 0.0004427343 }
 0x1f0   : > { %v549_v22 = vmul.f32 %v823_v15, %v548_v18 }
 0x1fb   : > { %v825_v20 = vpop.eup %824 }
 0x1fc   : > { %v546_v21 = vmul.f32 0.6931472, %v825_v20 }
 0x1fe   : > { %v552_v24 = vsel %vm551_vm0, %v549_v22, %v546_v21 }
 0x1ff   : > { %v553_v26 = vadd.f32 %v552_v24, %v536_v23 }
 0x201   : > { %v554_v27 = vsel %vm538_vm1, %v539_v25, %v553_v26 }
 0x202   : > { %v555_v28 = vadd.f32 %v554_v27, %v1067_v13 }
 0x204   : > { %v556_v29 = vmul.f32 1.442695, %v555_v28  ;;  %559 = vst [vmem:[#allocation2 - $0x7] sm:$0x80] %v555_v28 }
 0x206   : > { %826 = vpow2.f32 %v556_v29 }
 0x213   : > { %v827_v30 = vpop.eup %826 }
 0x214   : > { %558 = vst [vmem:[%s230_s30] sm:$0xff] %v827_v30 }
 0x215   : > { %867 = shalt.err (!%p864_p3)
}
 0x216   : > { %s868_s18 = scalar_lea.hbm %s1083_s7, 128  ;;  %s872_s23 = scalar_lea.hbm %s1126_s3, 256 }
 0x217   : > { %p869_p5 = scmp.ne.s32.totalorder %s1083_s7, %s868_s18  ;;  %p873_p9 = scmp.lt.s32.totalorder %s1083_s7, %s1126_s3 }
 0x218   : > { %p874_p12 = scmp.lt.s32.totalorder %s872_s23, %s868_s18 }
 0x219   : > { %p870_p6 = pnand %p869_p5, %p1002_p4 }
 0x21a   : > { %p875_p10 = por %p874_p12, %p873_p9 }
 0x21b   : > { %p871_p7 = pneg %p870_p6 }
 0x21d   : > { %p876_p11 = pnand %p875_p10, %p871_p7 }
 0x21f   : > { %879 = shalt.err (!%p876_p11)
}
 0x220   : > { %709 = dma.vmem_to_hbm [thread:$0]  (%p1002_p4), %s577_s4, 128, %s1083_s7, %s561_s8  }
 0x221 PF: > { %p721_p13 = scmp.ge.s32.totalorder %s934_s17, 2  ;;  %s588_s28 = sand.u32 1, %s914_s12  }
 0x222   : > { %s589_s29 = scalar_lea.sflag [#allocation5], %s588_s28 }
 0x223   : > { %p716_p0 = pnand %p721_p13, %p1009_p8 }
 0x225   : > { %p717_p1 = pneg %p716_p0 }
 0x227   : > { %909 = dma.done.wait (%p717_p1), %s589_s29, 128  }
 0x228   : > { %911 = vsyncadd (%p717_p1), %s589_s29, 4294967168  ;;  %s17_s17 = sadd.s32 1, %s934_s17   ;;  %s1131_s12 = smov %s918_s13 }
 0x229   : > { %p14_p2 = scmp.ge.s32.totalorder %s17_s17, 4   ;;  %s1132_s13 = smov %s922_s14 }
 0x22a   : > { %s1133_s14 = smov %s1015_s25  ;;  %s1134_s15 = smov %s930_s16 }
 0x22b   : > { %s1135_s16 = smov %s1137_s20  ;;  %16 = sbr.rel (!%p14_p2) target bundleno = 5 (0x5), region = 80 }
 0x230   :  { %594 = vsyncpa [#allocation4], 1 }
 0x231   :  { %596 = vsyncpa [#allocation4 + $0x1], 1 }
 0x232   :  { %597 = vsyncpa [#allocation5], 1 }
 0x233   :  { %599 = vsyncpa [#allocation5 + $0x1], 1 }

</bundles_post_ra>
